<compile_context>
chip_gen: v6e
topology: v6e:2x2x1
jax: 0.10.0
libtpu: 0.0.40
codegen_flags: <defaults>
</compile_context>

<pallas_src>
import jax
import jax.numpy as jnp
from jax import lax
from jax.experimental import pallas as pl
from jax.experimental.pallas import tpu as pltpu
import numpy as np


def _round_up(x, m):
    return (x + m - 1) // m * m


def _choose_tile_b(B, T, Hp, budget_bytes=12 << 20, cap=128):
    """Largest 8-aligned batch tile whose double-buffered f32 gx block fits the budget.

    Budget is conservative (fits the 16 MiB v5e default scoped VMEM and leaves slack
    on v7x's 64 MiB physical VMEM); cap=128 keeps per-sub-tile h/c carries in vregs.
    """
    per_row = 2 * T * 4 * Hp * 4  # double-buffered f32 bytes per batch row
    fit = max(8, (budget_bytes // per_row) // 8 * 8)
    return int(min(_round_up(B, 8), fit, cap))


def _lstm_kernel(perm_ref, gx_ref, whh_ref, out_ref):
    """LSTM recurrence over one batch tile.

    perm_ref: SMEM (T,) int32       -- permuted visiting order of the time axis
    gx_ref:   VMEM (T, tile_b, 4Hp) -- x @ W_ih^T + bias, gate order (i, f, o, g)
    whh_ref:  VMEM (Hp, 4Hp) bf16   -- W_hh^T, gate-blocked (Hp-wide) columns
    out_ref:  VMEM (tile_b, Hp) f32 -- final hidden state h_T for this tile
    """
    T, tile_b, _ = gx_ref.shape
    Hp = out_ref.shape[1]

    whh = whh_ref[...]  # resident recurrent weights, hoisted out of the loop

    # Two interleaved batch sub-tiles: sub-tile A's MXU matmul overlaps sub-tile B's
    # EUP transcendentals (the recurrence is serially dependent within a sub-tile).
    n_sub = 2 if tile_b >= 16 else 1
    sb = tile_b // n_sub

    def gate_update(gx_s, h_prev, c_prev):
        gates = gx_s + jnp.dot(h_prev.astype(jnp.bfloat16), whh,
                               preferred_element_type=jnp.float32)  # (sb, 4Hp) f32
        sig = jax.nn.sigmoid(gates[:, :3 * Hp])   # i, f, o in one contiguous EUP region
        i_g = sig[:, 0 * Hp:1 * Hp]
        f_g = sig[:, 1 * Hp:2 * Hp]
        o_g = sig[:, 2 * Hp:3 * Hp]
        g_g = jnp.tanh(gates[:, 3 * Hp:4 * Hp])
        c_new = f_g * c_prev + i_g * g_g
        h_new = o_g * jnp.tanh(c_new)
        return h_new, c_new

    def step(t, carry):
        hs, cs = carry
        gx_t = gx_ref[perm_ref[t]]  # (tile_b, 4Hp) f32, dynamic leading-axis slice
        new = tuple(gate_update(gx_t[s * sb:(s + 1) * sb, :], hs[s], cs[s])
                    for s in range(n_sub))
        return tuple(h for h, _ in new), tuple(c for _, c in new)

    zeros = tuple(jnp.zeros((sb, Hp), jnp.float32) for _ in range(n_sub))
    unroll = True if T <= 16 else 4  # bounded unroll for long neighbour lists
    hs, _ = lax.fori_loop(0, T, step, (zeros, zeros), unroll=unroll)

    for s in range(n_sub):
        out_ref[s * sb:(s + 1) * sb, :] = hs[s]  # single store per sub-tile


# PyTorch nn.LSTM gate order (i, f, g, o) -> kernel order (i, f, o, g)
_GATE_ORDER = (0, 1, 3, 2)


def lstm_aggregate(neighbours, w_ih, w_hh, b_ih, b_hh, perm_key, *, tile_b=None):
    """neighbours: (B, T, D). Returns (B, H) = lstm_out[:, -1, :]."""
    B, T, D = neighbours.shape
    H = w_hh.shape[1]
    Hp = _round_up(H, 128)  # lane-dense gate blocks + lane-dense output store

    if tile_b is None:
        tile_b = _choose_tile_b(B, T, Hp)
    tile_b = max(8, _round_up(int(tile_b), 8))
    B_pad = _round_up(max(B, tile_b), tile_b)
    grid_b = B_pad // tile_b

    # torch.randperm of the neighbour axis (deterministic JAX key; same semantics,
    # not bit-identical to torch's RNG stream).
    rand_order = jax.random.permutation(perm_key, T).astype(jnp.int32)

    order = jnp.array(_GATE_ORDER)

    # ---- hoisted x-path: gate-reordered/padded weights so the einsum emits gx directly
    # in the padded time-major layout (no pad/transpose copy of gx afterwards). --------
    w_ih_p = jnp.pad(w_ih.reshape(4, H, D)[order], ((0, 0), (0, Hp - H), (0, 0)))
    w_ih_p = w_ih_p.reshape(4 * Hp, D).astype(jnp.bfloat16)                 # (4Hp, D)
    bias_p = jnp.pad((b_ih + b_hh).reshape(4, H)[order], ((0, 0), (0, Hp - H)))
    bias_p = bias_p.reshape(4 * Hp).astype(jnp.float32)                     # (4Hp,)

    x_p = jnp.pad(neighbours, ((0, B_pad - B), (0, 0), (0, 0))).astype(jnp.bfloat16)
    gx_tm = jnp.einsum("btd,gd->tbg", x_p, w_ih_p,
                       preferred_element_type=jnp.float32) + bias_p         # (T, B_pad, 4Hp)

    # recurrent weights: (4H, H) -> W_hh^T, gate-reordered, gate-blocked, zero-padded.
    whh_blk = w_hh.reshape(4, H, H)[order]                                  # [g, out, in]
    whh_blk = jnp.pad(jnp.transpose(whh_blk, (0, 2, 1)),                    # [g, in, out]
                      ((0, 0), (0, Hp - H), (0, Hp - H)))                   # (4, Hp, Hp)
    whh_t = jnp.transpose(whh_blk, (1, 0, 2)).reshape(Hp, 4 * Hp).astype(jnp.bfloat16)

    # VMEM: double-buffered gx tile dominates; whh is tiny so its default double
    # buffering is negligible (no pipeline_mode override needed).
    gx_block_bytes = T * tile_b * 4 * Hp * 4
    vmem_limit = 2 * gx_block_bytes + 2 * Hp * 4 * Hp * 2 + 2 * tile_b * Hp * 4 + (4 << 20)
    vmem_limit = int(min(max(vmem_limit, 16 << 20), 48 << 20))

    out_p = pl.pallas_call(
        _lstm_kernel,
        out_shape=jax.ShapeDtypeStruct((B_pad, Hp), jnp.float32),
        grid_spec=pltpu.PrefetchScalarGridSpec(
            num_scalar_prefetch=1,              # rand_order -> SMEM
            grid=(grid_b,),                     # batch tiles, pipelined & parallel
            in_specs=[
                pl.BlockSpec((T, tile_b, 4 * Hp), lambda b, perm: (0, b, 0)),  # gx tile
                pl.BlockSpec((Hp, 4 * Hp), lambda b, perm: (0, 0)),            # W_hh^T
            ],
            out_specs=pl.BlockSpec((tile_b, Hp), lambda b, perm: (b, 0)),
        ),
        compiler_params=pltpu.CompilerParams(
            dimension_semantics=("parallel",),   # batch tiles independent (megacore)
            vmem_limit_bytes=vmem_limit),
    )(rand_order, gx_tm, whh_t)

    return out_p[:B, :H]


def lstm_reference(neighbours, w_ih, w_hh, b_ih, b_hh, perm_key):
    """Pure-JAX f32 reference (same math, PyTorch gate order) for correctness checks."""
    B, T, D = neighbours.shape
    H = w_hh.shape[1]
    rand_order = jax.random.permutation(perm_key, T)
    x = neighbours[:, rand_order, :].astype(jnp.float32)

    def step(carry, x_t):
        h, c = carry
        gates = x_t @ w_ih.T + b_ih + h @ w_hh.T + b_hh
        i_g = jax.nn.sigmoid(gates[:, 0 * H:1 * H])
        f_g = jax.nn.sigmoid(gates[:, 1 * H:2 * H])
        g_g = jnp.tanh(gates[:, 2 * H:3 * H])
        o_g = jax.nn.sigmoid(gates[:, 3 * H:4 * H])
        c_new = f_g * c + i_g * g_g
        h_new = o_g * jnp.tanh(c_new)
        return (h_new, c_new), None

    h0 = jnp.zeros((B, H), jnp.float32)
    c0 = jnp.zeros((B, H), jnp.float32)
    (h_T, _), _ = lax.scan(step, (h0, c0), jnp.transpose(x, (1, 0, 2)))
    return h_T


def init_lstm_params(key, in_feats, hidden_feats):
    """Deterministic param init matching nn.LSTM shapes (single layer)."""
    k1, k2, k3, k4 = jax.random.split(key, 4)
    H4 = 4 * hidden_feats
    gain = float(np.sqrt(2.0))  # calculate_gain('relu')
    bound_ih = gain * np.sqrt(6.0 / (H4 + in_feats))
    w_ih = jax.random.uniform(k1, (H4, in_feats), jnp.float32, -bound_ih, bound_ih)
    k_std = 1.0 / np.sqrt(hidden_feats)
    w_hh = jax.random.uniform(k2, (H4, hidden_feats), jnp.float32, -k_std, k_std)
    b_ih = jax.random.uniform(k3, (H4,), jnp.float32, -k_std, k_std)
    b_hh = jax.random.uniform(k4, (H4,), jnp.float32, -k_std, k_std)
    return w_ih, w_hh, b_ih, b_hh


if __name__ == "__main__":
    root = jax.random.PRNGKey(0)

    # --- test 1: tiny shapes (single tile, single sub-tile path) -------------------
    B, T, D, H = 2, 8, 4, 32
    k_x, k_p, k_perm = jax.random.split(jax.random.fold_in(root, 1), 3)
    neighbours = jax.random.normal(k_x, (B, T, D), jnp.float32)  # node.mailbox['m']
    params = init_lstm_params(k_p, D, H)

    out = lstm_aggregate(neighbours, *params, k_perm)
    out = jax.block_until_ready(out)
    ref = lstm_reference(neighbours, *params, k_perm)
    # bf16 MXU operands (f32 accumulation) -> relaxed tolerance vs the f32 reference.
    np.testing.assert_allclose(np.asarray(out), np.asarray(ref), rtol=2e-2, atol=2e-2)
    assert out.shape == (B, H)

    # --- test 2: multi-tile batch grid + two interleaved sub-tiles path -------------
    B2, T2, D2, H2 = 24, 12, 6, 32
    k_x2, k_p2, k_perm2 = jax.random.split(jax.random.fold_in(root, 2), 3)
    neighbours2 = jax.random.normal(k_x2, (B2, T2, D2), jnp.float32)
    params2 = init_lstm_params(k_p2, D2, H2)

    out2 = lstm_aggregate(neighbours2, *params2, k_perm2, tile_b=16)  # grid=2, n_sub=2
    out2 = jax.block_until_ready(out2)
    ref2 = lstm_reference(neighbours2, *params2, k_perm2)
    np.testing.assert_allclose(np.asarray(out2), np.asarray(ref2), rtol=2e-2, atol=2e-2)
    assert out2.shape == (B2, H2)

    print("KERNEL_OK")
</pallas_src>

<mosaic_0001>
module attributes {stable_mosaic.version = 11 : i64} {
  func.func @_lstm_kernel(%arg0: i32, %arg1: memref<8xi32, #tpu.memory_space<smem>>, %arg2: memref<8x8x512xf32, #tpu.memory_space<vmem>>, %arg3: memref<128x512xbf16, #tpu.memory_space<vmem>>, %arg4: memref<8x128xf32, #tpu.memory_space<vmem>>) attributes {dimension_semantics = [#tpu.dimension_semantics<parallel>], iteration_bounds = array<i64: 1>, scalar_prefetch = 1 : i64, scratch_operands = 0 : i64, tpu.core_type = #tpu.core_type<tc>, window_params = [{transform_indices = @transform_0, window_bounds = array<i64: 8, 8, 512>}, {pipeline_mode = #tpu.pipeline_mode<synchronous>, transform_indices = @transform_1, window_bounds = array<i64: 128, 512>}, {transform_indices = @transform_2, window_bounds = array<i64: 8, 128>}]} {
    %c0 = arith.constant 0 : index
    %c0_0 = arith.constant 0 : index
    %0 = vector.load %arg3[%c0, %c0_0] : memref<128x512xbf16, #tpu.memory_space<vmem>>, vector<128x512xbf16>
    %cst = arith.constant 0.000000e+00 : f32
    %1 = vector.broadcast %cst : f32 to vector<8x128xf32>
    %c0_i32 = arith.constant 0 : i32
    %2 = arith.index_cast %c0_i32 : i32 to index
    %3 = memref.load %arg1[%2] : memref<8xi32, #tpu.memory_space<smem>>
    %4 = arith.index_cast %3 : i32 to index
    %c0_1 = arith.constant 0 : index
    %c0_2 = arith.constant 0 : index
    %5 = vector.load %arg2[%4, %c0_1, %c0_2] : memref<8x8x512xf32, #tpu.memory_space<vmem>>, vector<1x8x512xf32>
    %6 = vector.shape_cast %5 : vector<1x8x512xf32> to vector<8x512xf32>
    %7 = arith.truncf %1 : vector<8x128xf32> to vector<8x128xbf16>
    %cst_3 = arith.constant dense<0.000000e+00> : vector<8x512xf32>
    %8 = tpu.matmul %7, %0, %cst_3 {dimension_numbers = #tpu.dot_dimension_numbers<[1], [0], [0], [1], [0, 0, 1, 1], [], []>} : vector<8x128xbf16>, vector<128x512xbf16>, vector<8x512xf32> -> vector<8x512xf32>
    %9 = arith.addf %6, %8 : vector<8x512xf32>
    %10 = vector.extract_strided_slice %9 {offsets = [0, 0], sizes = [8, 384], strides = [1, 1]} : vector<8x512xf32> to vector<8x384xf32>
    %11 = arith.negf %10 : vector<8x384xf32>
    %12 = math.exp %11 : vector<8x384xf32>
    %cst_4 = arith.constant 1.000000e+00 : f32
    %13 = vector.broadcast %cst_4 : f32 to vector<8x384xf32>
    %14 = arith.addf %13, %12 : vector<8x384xf32>
    %15 = arith.divf %13, %14 : vector<8x384xf32>
    %16 = vector.extract_strided_slice %15 {offsets = [0, 0], sizes = [8, 128], strides = [1, 1]} : vector<8x384xf32> to vector<8x128xf32>
    %17 = vector.extract_strided_slice %15 {offsets = [0, 128], sizes = [8, 128], strides = [1, 1]} : vector<8x384xf32> to vector<8x128xf32>
    %18 = vector.extract_strided_slice %15 {offsets = [0, 256], sizes = [8, 128], strides = [1, 1]} : vector<8x384xf32> to vector<8x128xf32>
    %19 = vector.extract_strided_slice %9 {offsets = [0, 384], sizes = [8, 128], strides = [1, 1]} : vector<8x512xf32> to vector<8x128xf32>
    %20 = math.tanh %19 : vector<8x128xf32>
    %21 = arith.mulf %17, %1 : vector<8x128xf32>
    %22 = arith.mulf %16, %20 : vector<8x128xf32>
    %23 = arith.addf %21, %22 : vector<8x128xf32>
    %24 = math.tanh %23 : vector<8x128xf32>
    %25 = arith.mulf %18, %24 : vector<8x128xf32>
    %c1_i32 = arith.constant 1 : i32
    %26 = arith.index_cast %c1_i32 : i32 to index
    %27 = memref.load %arg1[%26] : memref<8xi32, #tpu.memory_space<smem>>
    %28 = arith.index_cast %27 : i32 to index
    %c0_5 = arith.constant 0 : index
    %c0_6 = arith.constant 0 : index
    %29 = vector.load %arg2[%28, %c0_5, %c0_6] : memref<8x8x512xf32, #tpu.memory_space<vmem>>, vector<1x8x512xf32>
    %30 = vector.shape_cast %29 : vector<1x8x512xf32> to vector<8x512xf32>
    %31 = arith.truncf %25 : vector<8x128xf32> to vector<8x128xbf16>
    %cst_7 = arith.constant dense<0.000000e+00> : vector<8x512xf32>
    %32 = tpu.matmul %31, %0, %cst_7 {dimension_numbers = #tpu.dot_dimension_numbers<[1], [0], [0], [1], [0, 0, 1, 1], [], []>} : vector<8x128xbf16>, vector<128x512xbf16>, vector<8x512xf32> -> vector<8x512xf32>
    %33 = arith.addf %30, %32 : vector<8x512xf32>
    %34 = vector.extract_strided_slice %33 {offsets = [0, 0], sizes = [8, 384], strides = [1, 1]} : vector<8x512xf32> to vector<8x384xf32>
    %35 = arith.negf %34 : vector<8x384xf32>
    %36 = math.exp %35 : vector<8x384xf32>
    %cst_8 = arith.constant 1.000000e+00 : f32
    %37 = vector.broadcast %cst_8 : f32 to vector<8x384xf32>
    %38 = arith.addf %37, %36 : vector<8x384xf32>
    %39 = arith.divf %37, %38 : vector<8x384xf32>
    %40 = vector.extract_strided_slice %39 {offsets = [0, 0], sizes = [8, 128], strides = [1, 1]} : vector<8x384xf32> to vector<8x128xf32>
    %41 = vector.extract_strided_slice %39 {offsets = [0, 128], sizes = [8, 128], strides = [1, 1]} : vector<8x384xf32> to vector<8x128xf32>
    %42 = vector.extract_strided_slice %39 {offsets = [0, 256], sizes = [8, 128], strides = [1, 1]} : vector<8x384xf32> to vector<8x128xf32>
    %43 = vector.extract_strided_slice %33 {offsets = [0, 384], sizes = [8, 128], strides = [1, 1]} : vector<8x512xf32> to vector<8x128xf32>
    %44 = math.tanh %43 : vector<8x128xf32>
    %45 = arith.mulf %41, %23 : vector<8x128xf32>
    %46 = arith.mulf %40, %44 : vector<8x128xf32>
    %47 = arith.addf %45, %46 : vector<8x128xf32>
    %48 = math.tanh %47 : vector<8x128xf32>
    %49 = arith.mulf %42, %48 : vector<8x128xf32>
    %c2_i32 = arith.constant 2 : i32
    %50 = arith.index_cast %c2_i32 : i32 to index
    %51 = memref.load %arg1[%50] : memref<8xi32, #tpu.memory_space<smem>>
    %52 = arith.index_cast %51 : i32 to index
    %c0_9 = arith.constant 0 : index
    %c0_10 = arith.constant 0 : index
    %53 = vector.load %arg2[%52, %c0_9, %c0_10] : memref<8x8x512xf32, #tpu.memory_space<vmem>>, vector<1x8x512xf32>
    %54 = vector.shape_cast %53 : vector<1x8x512xf32> to vector<8x512xf32>
    %55 = arith.truncf %49 : vector<8x128xf32> to vector<8x128xbf16>
    %cst_11 = arith.constant dense<0.000000e+00> : vector<8x512xf32>
    %56 = tpu.matmul %55, %0, %cst_11 {dimension_numbers = #tpu.dot_dimension_numbers<[1], [0], [0], [1], [0, 0, 1, 1], [], []>} : vector<8x128xbf16>, vector<128x512xbf16>, vector<8x512xf32> -> vector<8x512xf32>
    %57 = arith.addf %54, %56 : vector<8x512xf32>
    %58 = vector.extract_strided_slice %57 {offsets = [0, 0], sizes = [8, 384], strides = [1, 1]} : vector<8x512xf32> to vector<8x384xf32>
    %59 = arith.negf %58 : vector<8x384xf32>
    %60 = math.exp %59 : vector<8x384xf32>
    %cst_12 = arith.constant 1.000000e+00 : f32
    %61 = vector.broadcast %cst_12 : f32 to vector<8x384xf32>
    %62 = arith.addf %61, %60 : vector<8x384xf32>
    %63 = arith.divf %61, %62 : vector<8x384xf32>
    %64 = vector.extract_strided_slice %63 {offsets = [0, 0], sizes = [8, 128], strides = [1, 1]} : vector<8x384xf32> to vector<8x128xf32>
    %65 = vector.extract_strided_slice %63 {offsets = [0, 128], sizes = [8, 128], strides = [1, 1]} : vector<8x384xf32> to vector<8x128xf32>
    %66 = vector.extract_strided_slice %63 {offsets = [0, 256], sizes = [8, 128], strides = [1, 1]} : vector<8x384xf32> to vector<8x128xf32>
    %67 = vector.extract_strided_slice %57 {offsets = [0, 384], sizes = [8, 128], strides = [1, 1]} : vector<8x512xf32> to vector<8x128xf32>
    %68 = math.tanh %67 : vector<8x128xf32>
    %69 = arith.mulf %65, %47 : vector<8x128xf32>
    %70 = arith.mulf %64, %68 : vector<8x128xf32>
    %71 = arith.addf %69, %70 : vector<8x128xf32>
    %72 = math.tanh %71 : vector<8x128xf32>
    %73 = arith.mulf %66, %72 : vector<8x128xf32>
    %c3_i32 = arith.constant 3 : i32
    %74 = arith.index_cast %c3_i32 : i32 to index
    %75 = memref.load %arg1[%74] : memref<8xi32, #tpu.memory_space<smem>>
    %76 = arith.index_cast %75 : i32 to index
    %c0_13 = arith.constant 0 : index
    %c0_14 = arith.constant 0 : index
    %77 = vector.load %arg2[%76, %c0_13, %c0_14] : memref<8x8x512xf32, #tpu.memory_space<vmem>>, vector<1x8x512xf32>
    %78 = vector.shape_cast %77 : vector<1x8x512xf32> to vector<8x512xf32>
    %79 = arith.truncf %73 : vector<8x128xf32> to vector<8x128xbf16>
    %cst_15 = arith.constant dense<0.000000e+00> : vector<8x512xf32>
    %80 = tpu.matmul %79, %0, %cst_15 {dimension_numbers = #tpu.dot_dimension_numbers<[1], [0], [0], [1], [0, 0, 1, 1], [], []>} : vector<8x128xbf16>, vector<128x512xbf16>, vector<8x512xf32> -> vector<8x512xf32>
    %81 = arith.addf %78, %80 : vector<8x512xf32>
    %82 = vector.extract_strided_slice %81 {offsets = [0, 0], sizes = [8, 384], strides = [1, 1]} : vector<8x512xf32> to vector<8x384xf32>
    %83 = arith.negf %82 : vector<8x384xf32>
    %84 = math.exp %83 : vector<8x384xf32>
    %cst_16 = arith.constant 1.000000e+00 : f32
    %85 = vector.broadcast %cst_16 : f32 to vector<8x384xf32>
    %86 = arith.addf %85, %84 : vector<8x384xf32>
    %87 = arith.divf %85, %86 : vector<8x384xf32>
    %88 = vector.extract_strided_slice %87 {offsets = [0, 0], sizes = [8, 128], strides = [1, 1]} : vector<8x384xf32> to vector<8x128xf32>
    %89 = vector.extract_strided_slice %87 {offsets = [0, 128], sizes = [8, 128], strides = [1, 1]} : vector<8x384xf32> to vector<8x128xf32>
    %90 = vector.extract_strided_slice %87 {offsets = [0, 256], sizes = [8, 128], strides = [1, 1]} : vector<8x384xf32> to vector<8x128xf32>
    %91 = vector.extract_strided_slice %81 {offsets = [0, 384], sizes = [8, 128], strides = [1, 1]} : vector<8x512xf32> to vector<8x128xf32>
    %92 = math.tanh %91 : vector<8x128xf32>
    %93 = arith.mulf %89, %71 : vector<8x128xf32>
    %94 = arith.mulf %88, %92 : vector<8x128xf32>
    %95 = arith.addf %93, %94 : vector<8x128xf32>
    %96 = math.tanh %95 : vector<8x128xf32>
    %97 = arith.mulf %90, %96 : vector<8x128xf32>
    %c4_i32 = arith.constant 4 : i32
    %98 = arith.index_cast %c4_i32 : i32 to index
    %99 = memref.load %arg1[%98] : memref<8xi32, #tpu.memory_space<smem>>
    %100 = arith.index_cast %99 : i32 to index
    %c0_17 = arith.constant 0 : index
    %c0_18 = arith.constant 0 : index
    %101 = vector.load %arg2[%100, %c0_17, %c0_18] : memref<8x8x512xf32, #tpu.memory_space<vmem>>, vector<1x8x512xf32>
    %102 = vector.shape_cast %101 : vector<1x8x512xf32> to vector<8x512xf32>
    %103 = arith.truncf %97 : vector<8x128xf32> to vector<8x128xbf16>
    %cst_19 = arith.constant dense<0.000000e+00> : vector<8x512xf32>
    %104 = tpu.matmul %103, %0, %cst_19 {dimension_numbers = #tpu.dot_dimension_numbers<[1], [0], [0], [1], [0, 0, 1, 1], [], []>} : vector<8x128xbf16>, vector<128x512xbf16>, vector<8x512xf32> -> vector<8x512xf32>
    %105 = arith.addf %102, %104 : vector<8x512xf32>
    %106 = vector.extract_strided_slice %105 {offsets = [0, 0], sizes = [8, 384], strides = [1, 1]} : vector<8x512xf32> to vector<8x384xf32>
    %107 = arith.negf %106 : vector<8x384xf32>
    %108 = math.exp %107 : vector<8x384xf32>
    %cst_20 = arith.constant 1.000000e+00 : f32
    %109 = vector.broadcast %cst_20 : f32 to vector<8x384xf32>
    %110 = arith.addf %109, %108 : vector<8x384xf32>
    %111 = arith.divf %109, %110 : vector<8x384xf32>
    %112 = vector.extract_strided_slice %111 {offsets = [0, 0], sizes = [8, 128], strides = [1, 1]} : vector<8x384xf32> to vector<8x128xf32>
    %113 = vector.extract_strided_slice %111 {offsets = [0, 128], sizes = [8, 128], strides = [1, 1]} : vector<8x384xf32> to vector<8x128xf32>
    %114 = vector.extract_strided_slice %111 {offsets = [0, 256], sizes = [8, 128], strides = [1, 1]} : vector<8x384xf32> to vector<8x128xf32>
    %115 = vector.extract_strided_slice %105 {offsets = [0, 384], sizes = [8, 128], strides = [1, 1]} : vector<8x512xf32> to vector<8x128xf32>
    %116 = math.tanh %115 : vector<8x128xf32>
    %117 = arith.mulf %113, %95 : vector<8x128xf32>
    %118 = arith.mulf %112, %116 : vector<8x128xf32>
    %119 = arith.addf %117, %118 : vector<8x128xf32>
    %120 = math.tanh %119 : vector<8x128xf32>
    %121 = arith.mulf %114, %120 : vector<8x128xf32>
    %c5_i32 = arith.constant 5 : i32
    %122 = arith.index_cast %c5_i32 : i32 to index
    %123 = memref.load %arg1[%122] : memref<8xi32, #tpu.memory_space<smem>>
    %124 = arith.index_cast %123 : i32 to index
    %c0_21 = arith.constant 0 : index
    %c0_22 = arith.constant 0 : index
    %125 = vector.load %arg2[%124, %c0_21, %c0_22] : memref<8x8x512xf32, #tpu.memory_space<vmem>>, vector<1x8x512xf32>
    %126 = vector.shape_cast %125 : vector<1x8x512xf32> to vector<8x512xf32>
    %127 = arith.truncf %121 : vector<8x128xf32> to vector<8x128xbf16>
    %cst_23 = arith.constant dense<0.000000e+00> : vector<8x512xf32>
    %128 = tpu.matmul %127, %0, %cst_23 {dimension_numbers = #tpu.dot_dimension_numbers<[1], [0], [0], [1], [0, 0, 1, 1], [], []>} : vector<8x128xbf16>, vector<128x512xbf16>, vector<8x512xf32> -> vector<8x512xf32>
    %129 = arith.addf %126, %128 : vector<8x512xf32>
    %130 = vector.extract_strided_slice %129 {offsets = [0, 0], sizes = [8, 384], strides = [1, 1]} : vector<8x512xf32> to vector<8x384xf32>
    %131 = arith.negf %130 : vector<8x384xf32>
    %132 = math.exp %131 : vector<8x384xf32>
    %cst_24 = arith.constant 1.000000e+00 : f32
    %133 = vector.broadcast %cst_24 : f32 to vector<8x384xf32>
    %134 = arith.addf %133, %132 : vector<8x384xf32>
    %135 = arith.divf %133, %134 : vector<8x384xf32>
    %136 = vector.extract_strided_slice %135 {offsets = [0, 0], sizes = [8, 128], strides = [1, 1]} : vector<8x384xf32> to vector<8x128xf32>
    %137 = vector.extract_strided_slice %135 {offsets = [0, 128], sizes = [8, 128], strides = [1, 1]} : vector<8x384xf32> to vector<8x128xf32>
    %138 = vector.extract_strided_slice %135 {offsets = [0, 256], sizes = [8, 128], strides = [1, 1]} : vector<8x384xf32> to vector<8x128xf32>
    %139 = vector.extract_strided_slice %129 {offsets = [0, 384], sizes = [8, 128], strides = [1, 1]} : vector<8x512xf32> to vector<8x128xf32>
    %140 = math.tanh %139 : vector<8x128xf32>
    %141 = arith.mulf %137, %119 : vector<8x128xf32>
    %142 = arith.mulf %136, %140 : vector<8x128xf32>
    %143 = arith.addf %141, %142 : vector<8x128xf32>
    %144 = math.tanh %143 : vector<8x128xf32>
    %145 = arith.mulf %138, %144 : vector<8x128xf32>
    %c6_i32 = arith.constant 6 : i32
    %146 = arith.index_cast %c6_i32 : i32 to index
    %147 = memref.load %arg1[%146] : memref<8xi32, #tpu.memory_space<smem>>
    %148 = arith.index_cast %147 : i32 to index
    %c0_25 = arith.constant 0 : index
    %c0_26 = arith.constant 0 : index
    %149 = vector.load %arg2[%148, %c0_25, %c0_26] : memref<8x8x512xf32, #tpu.memory_space<vmem>>, vector<1x8x512xf32>
    %150 = vector.shape_cast %149 : vector<1x8x512xf32> to vector<8x512xf32>
    %151 = arith.truncf %145 : vector<8x128xf32> to vector<8x128xbf16>
    %cst_27 = arith.constant dense<0.000000e+00> : vector<8x512xf32>
    %152 = tpu.matmul %151, %0, %cst_27 {dimension_numbers = #tpu.dot_dimension_numbers<[1], [0], [0], [1], [0, 0, 1, 1], [], []>} : vector<8x128xbf16>, vector<128x512xbf16>, vector<8x512xf32> -> vector<8x512xf32>
    %153 = arith.addf %150, %152 : vector<8x512xf32>
    %154 = vector.extract_strided_slice %153 {offsets = [0, 0], sizes = [8, 384], strides = [1, 1]} : vector<8x512xf32> to vector<8x384xf32>
    %155 = arith.negf %154 : vector<8x384xf32>
    %156 = math.exp %155 : vector<8x384xf32>
    %cst_28 = arith.constant 1.000000e+00 : f32
    %157 = vector.broadcast %cst_28 : f32 to vector<8x384xf32>
    %158 = arith.addf %157, %156 : vector<8x384xf32>
    %159 = arith.divf %157, %158 : vector<8x384xf32>
    %160 = vector.extract_strided_slice %159 {offsets = [0, 0], sizes = [8, 128], strides = [1, 1]} : vector<8x384xf32> to vector<8x128xf32>
    %161 = vector.extract_strided_slice %159 {offsets = [0, 128], sizes = [8, 128], strides = [1, 1]} : vector<8x384xf32> to vector<8x128xf32>
    %162 = vector.extract_strided_slice %159 {offsets = [0, 256], sizes = [8, 128], strides = [1, 1]} : vector<8x384xf32> to vector<8x128xf32>
    %163 = vector.extract_strided_slice %153 {offsets = [0, 384], sizes = [8, 128], strides = [1, 1]} : vector<8x512xf32> to vector<8x128xf32>
    %164 = math.tanh %163 : vector<8x128xf32>
    %165 = arith.mulf %161, %143 : vector<8x128xf32>
    %166 = arith.mulf %160, %164 : vector<8x128xf32>
    %167 = arith.addf %165, %166 : vector<8x128xf32>
    %168 = math.tanh %167 : vector<8x128xf32>
    %169 = arith.mulf %162, %168 : vector<8x128xf32>
    %c7_i32 = arith.constant 7 : i32
    %170 = arith.index_cast %c7_i32 : i32 to index
    %171 = memref.load %arg1[%170] : memref<8xi32, #tpu.memory_space<smem>>
    %172 = arith.index_cast %171 : i32 to index
    %c0_29 = arith.constant 0 : index
    %c0_30 = arith.constant 0 : index
    %173 = vector.load %arg2[%172, %c0_29, %c0_30] : memref<8x8x512xf32, #tpu.memory_space<vmem>>, vector<1x8x512xf32>
    %174 = vector.shape_cast %173 : vector<1x8x512xf32> to vector<8x512xf32>
    %175 = arith.truncf %169 : vector<8x128xf32> to vector<8x128xbf16>
    %cst_31 = arith.constant dense<0.000000e+00> : vector<8x512xf32>
    %176 = tpu.matmul %175, %0, %cst_31 {dimension_numbers = #tpu.dot_dimension_numbers<[1], [0], [0], [1], [0, 0, 1, 1], [], []>} : vector<8x128xbf16>, vector<128x512xbf16>, vector<8x512xf32> -> vector<8x512xf32>
    %177 = arith.addf %174, %176 : vector<8x512xf32>
    %178 = vector.extract_strided_slice %177 {offsets = [0, 0], sizes = [8, 384], strides = [1, 1]} : vector<8x512xf32> to vector<8x384xf32>
    %179 = arith.negf %178 : vector<8x384xf32>
    %180 = math.exp %179 : vector<8x384xf32>
    %cst_32 = arith.constant 1.000000e+00 : f32
    %181 = vector.broadcast %cst_32 : f32 to vector<8x384xf32>
    %182 = arith.addf %181, %180 : vector<8x384xf32>
    %183 = arith.divf %181, %182 : vector<8x384xf32>
    %184 = vector.extract_strided_slice %183 {offsets = [0, 0], sizes = [8, 128], strides = [1, 1]} : vector<8x384xf32> to vector<8x128xf32>
    %185 = vector.extract_strided_slice %183 {offsets = [0, 128], sizes = [8, 128], strides = [1, 1]} : vector<8x384xf32> to vector<8x128xf32>
    %186 = vector.extract_strided_slice %183 {offsets = [0, 256], sizes = [8, 128], strides = [1, 1]} : vector<8x384xf32> to vector<8x128xf32>
    %187 = vector.extract_strided_slice %177 {offsets = [0, 384], sizes = [8, 128], strides = [1, 1]} : vector<8x512xf32> to vector<8x128xf32>
    %188 = math.tanh %187 : vector<8x128xf32>
    %189 = arith.mulf %185, %167 : vector<8x128xf32>
    %190 = arith.mulf %184, %188 : vector<8x128xf32>
    %191 = arith.addf %189, %190 : vector<8x128xf32>
    %192 = math.tanh %191 : vector<8x128xf32>
    %193 = arith.mulf %186, %192 : vector<8x128xf32>
    %c8_i32 = arith.constant 8 : i32
    %c0_33 = arith.constant 0 : index
    %c0_34 = arith.constant 0 : index
    %194 = vector.load %arg4[%c0_33, %c0_34] : memref<8x128xf32, #tpu.memory_space<vmem>>, vector<8x128xf32>
    tpu.vector_store %arg4[%c0_33, %c0_34], %193 {strides = array<i32>} : memref<8x128xf32, #tpu.memory_space<vmem>>, vector<8x128xf32>,
    return
  }
  func.func @transform_0(%arg0: i32, %arg1: memref<8xi32, #tpu.memory_space<smem>>) -> (i32, i32, i32) {
    %c0_i32 = arith.constant 0 : i32
    %c0_i32_0 = arith.constant 0 : i32
    %c0_i32_1 = arith.constant 0 : i32
    return %c0_i32, %arg0, %c0_i32_0 : i32, i32, i32
  }
  func.func @transform_1(%arg0: i32, %arg1: memref<8xi32, #tpu.memory_space<smem>>) -> (i32, i32) {
    %c0_i32 = arith.constant 0 : i32
    %c0_i32_0 = arith.constant 0 : i32
    %c0_i32_1 = arith.constant 0 : i32
    return %c0_i32, %c0_i32_0 : i32, i32
  }
  func.func @transform_2(%arg0: i32, %arg1: memref<8xi32, #tpu.memory_space<smem>>) -> (i32, i32) {
    %c0_i32 = arith.constant 0 : i32
    %c0_i32_0 = arith.constant 0 : i32
    return %arg0, %c0_i32 : i32, i32
  }
}

</mosaic_0001>

<bundles_post_ra>
// kernel: tpu_custom_call.1
= control target key start
LH: loop header
LB: loop body
LE: loop exit
PB: predicated region body
PF: predicated region fallthrough
CT: control target
= control target key end

     0   :  { %s1602_s12 = smov [#allocation3]   ;;  %s1973_s0 = inlined_call_operand.hbm [shape: s32[8], index: 0, kind: input, shape index: {}]   ;;  %s1974_s1 = inlined_call_operand.hbm [shape: f32[8,8,512], index: 1, kind: input, shape index: {}]   ;;  %s1975_s2 = inlined_call_operand.hbm [shape: bf16[128,512], index: 2, kind: input, shape index: {}]   ;;  %s1976_s3 = inlined_call_operand.hbm [shape: f32[8,128], index: 3, kind: output, shape index: {}]  }
   0x1   :  { %9 = dma.hbm_to_smem %s1973_s0, 16, %s1602_s12, [#allocation2] }
   0x2   :  { %1594 = dma.done.wait [#allocation2], 16 }
   0x3   :  { %1595 = vsyncadd [#allocation2], 4294967280 }
   0x4   :  { %11 = sfence }
   0x5   :  { %12 = vsyncpa [#allocation5], 0 }
   0x6   :  { %13 = vsyncpa [#allocation8], 0 }
   0x7   :  { %14 = vsyncpa [#allocation6], 0  ;;  %s1603_s15 = smov [#allocation4]  }
   0x8   :  { %s20_s16 = sshll.u32 %s1603_s15, 4  ;;  %s21_s16 = int_to_ptr.vmem [resolvable:$true] %s20_s16 }
   0x9   :  { %s1542_s17 = scalar_lea.vmem %s21_s16, 4096  ;;  %p1547_p1 = scmp.lt.s32.totalorder %s21_s16, %s21_s16 }
   0xa   :  { %p1543_p0 = scmp.ne.s32.totalorder %s21_s16, %s1542_s17  ;;  %p1548_p2 = scmp.lt.s32.totalorder %s1542_s17, %s1542_s17 }
   0xc   :  { %p1549_p3 = por %p1548_p2, %p1547_p1 }
   0xe   :  { %p1550_p4 = pnand %p1549_p3, %p1543_p0 }
  0x10   :  { %1553 = shalt.err (!%p1550_p4)
}
  0x11   :  { %s1604_s18 = smov 512   ;;  %s1605_s19 = smov 32  }
  0x12   :  { %26 = dma.hbm_to_vmem [thread:$0]  %s1974_s1, 4096, %s21_s16, [#allocation5], %s1604_s18, %s1604_s18, %s1605_s19  }
  0x13   :  { %s1606_s21 = smov [#allocation7]  }
  0x14   :  { %s32_s22 = sshll.u32 %s1606_s21, 4  ;;  %s33_s22 = int_to_ptr.vmem [resolvable:$true] %s32_s22 }
  0x15   :  { %s1562_s23 = scalar_lea.vmem %s33_s22, 4096  ;;  %p1567_p6 = scmp.lt.s32.totalorder %s33_s22, %s33_s22 }
  0x16   :  { %p1563_p5 = scmp.ne.s32.totalorder %s33_s22, %s1562_s23  ;;  %p1568_p7 = scmp.lt.s32.totalorder %s1562_s23, %s1562_s23 }
  0x18   :  { %p1569_p8 = por %p1568_p7, %p1567_p6 }
  0x1a   :  { %p1570_p9 = pnand %p1569_p8, %p1563_p5 }
  0x1c   :  { %1573 = shalt.err (!%p1570_p9)
}
  0x1d   :  { %s1607_s24 = smov 256   ;;  %s1608_s25 = smov 16  }
  0x1e   :  { %38 = dma.hbm_to_vmem [thread:$0]  %s1975_s2, 4096, %s33_s22, [#allocation8], %s1607_s24, %s1607_s24, %s1608_s25  }
  0x1f   :  { %1596 = dma.done.wait [#allocation5], 4096  }
  0x20   :  { %1597 = vsyncadd [#allocation5], 4294963200 }
  0x21   :  { %1598 = dma.done.wait [#allocation8], 4096  }
  0x22   :  { %1599 = vsyncadd [#allocation8], 4294963200  ;;  %v1609_v0 = vmov 0   ;;  %v1642_v1 = vld [vmem:[#allocation7 + $0xe4] ss:$16 sps:$4 sm:$0xff]   ;;  %s78_s1 = sld [smem:[#allocation3]] }
  0x23   :  { %278 = vmatprep.mubr.bf16.mxu0 %v1609_v0  ;;  %319 = vmatprep.mubr.bf16.mxu1 %v1609_v0  ;;  %v1644_v2 = vld [vmem:[#allocation7 + $0xe0] ss:$16 sps:$4 sm:$0xff]   ;;  %v1647_v3 = vld [vmem:[#allocation7 + $0xc4] ss:$16 sps:$4 sm:$0xff]   ;;  %v1655_v6 = vld [vmem:[#allocation7 + $0xec] ss:$16 sps:$4 sm:$0xff]  }
  0x24   :  { %246 = vmatprep.subr.bf16.mxu0 %v1642_v1  ;;  %v1650_v4 = vld [vmem:[#allocation7 + $0xc0] ss:$16 sps:$4 sm:$0xff]   ;;  %v1653_v5 = vld [vmem:[#allocation7 + $0xa4] ss:$16 sps:$4 sm:$0xff]   ;;  %v1657_v7 = vld [vmem:[#allocation7 + $0xe8] ss:$16 sps:$4 sm:$0xff]   ;;  %287 = vmatprep.subr.bf16.mxu1 %v1655_v6 }
  0x25   :  { %247 = vmatpush1.bf16.msra.mxu0 %v1644_v2  ;;  %v1660_v8 = vld [vmem:[#allocation7 + $0xa0] ss:$16 sps:$4 sm:$0xff]   ;;  %v1664_v9 = vld [vmem:[#allocation7 + $0x84] ss:$16 sps:$4 sm:$0xff]   ;;  %288 = vmatpush1.bf16.msra.mxu1 %v1657_v7  ;;  %v1667_v10 = vld [vmem:[#allocation7 + $0xcc] ss:$16 sps:$4 sm:$0xff]  }
  0x26   :  { %248 = vmatprep.subr.bf16.mxu0 %v1647_v3  ;;  %v1669_v11 = vld [vmem:[#allocation7 + $0xc8] ss:$16 sps:$4 sm:$0xff]   ;;  %289 = vmatprep.subr.bf16.mxu1 %v1667_v10  ;;  %v1673_v12 = vld [vmem:[#allocation7 + $0x80] ss:$16 sps:$4 sm:$0xff]   ;;  %v1675_v13 = vld [vmem:[#allocation7 + $0x64] ss:$16 sps:$4 sm:$0xff]  }
  0x27   :  { %v1677_v14 = vld [vmem:[#allocation7 + $0xac] ss:$16 sps:$4 sm:$0xff]   ;;  %v1681_v15 = vld [vmem:[#allocation7 + $0xa8] ss:$16 sps:$4 sm:$0xff]   ;;  %v1687_v17 = vld [vmem:[#allocation7 + $0x60] ss:$16 sps:$4 sm:$0xff]  }
  0x28   :  { %v1684_v16 = vld [vmem:[#allocation7 + $0x8c] ss:$16 sps:$4 sm:$0xff]   ;;  %v1690_v18 = vld [vmem:[#allocation7 + $0x44] ss:$16 sps:$4 sm:$0xff]   ;;  %v1693_v19 = vld [vmem:[#allocation7 + $0x88] ss:$16 sps:$4 sm:$0xff]  }
  0x29   :  { %249 = vmatpush1.bf16.msra.mxu0 %v1650_v4  ;;  %290 = vmatpush1.bf16.msra.mxu1 %v1669_v11  ;;  %v1696_v20 = vld [vmem:[#allocation7 + $0x6c] ss:$16 sps:$4 sm:$0xff]   ;;  %v1699_v21 = vld [vmem:[#allocation7 + $0x40] ss:$16 sps:$4 sm:$0xff]   ;;  %v1701_v22 = vld [vmem:[#allocation7 + $0x24] ss:$16 sps:$4 sm:$0xff]  }
  0x2a   :  { %250 = vmatprep.subr.bf16.mxu0 %v1653_v5  ;;  %291 = vmatprep.subr.bf16.mxu1 %v1677_v14  ;;  %v1705_v23 = vld [vmem:[#allocation7 + $0x68] ss:$16 sps:$4 sm:$0xff]   ;;  %v1708_v24 = vld [vmem:[#allocation7 + $0x4c] ss:$16 sps:$4 sm:$0xff]   ;;  %v1711_v25 = vld [vmem:[#allocation7 + $0x20] ss:$16 sps:$4 sm:$0xff]  }
  0x2b   :  { %v1714_v26 = vld [vmem:[#allocation7 + $0x4] ss:$16 sps:$4 sm:$0xff]   ;;  %v1717_v27 = vld [vmem:[#allocation7 + $0x48] ss:$16 sps:$4 sm:$0xff]   ;;  %v1720_v28 = vld [vmem:[#allocation7 + $0x2c] ss:$16 sps:$4 sm:$0xff]  }
  0x2c   :  { %v1723_v29 = vld [vmem:[#allocation7] ss:$16 sps:$4 sm:$0xff]   ;;  %v1727_v30 = vld [vmem:[#allocation7 + $0x28] ss:$16 sps:$4 sm:$0xff]   ;;  %v1730_v31 = vld [vmem:[#allocation7 + $0xc] ss:$16 sps:$4 sm:$0xff]  }
  0x2d   :  { %251 = vmatpush1.bf16.msra.mxu0 %v1660_v8  ;;  %292 = vmatpush1.bf16.msra.mxu1 %v1681_v15  ;;  %v1734_v32 = vld [vmem:[#allocation7 + $0x8] ss:$16 sps:$4 sm:$0xff]   ;;  %s1301_s2 = sshll.u32 %s78_s1, 5  ;;  %s1259_s29 = sld [smem:[#allocation3 + $0x1]] }
  0x2e   :  { %252 = vmatprep.subr.bf16.mxu0 %v1664_v9  ;;  %293 = vmatprep.subr.bf16.mxu1 %v1684_v16  ;;  %s81_s28 = scalar_lea.vmem [#allocation4], %s1301_s2  ;;  %s1265_s5 = sld [smem:[#allocation3 + $0x2]] }
  0x2f   :  { %v82_v33 = vld [vmem:[%s81_s28] sm:$0xff]  ;;  %v83_v35 = vld [vmem:[%s81_s28 + $0x8] sm:$0xff]  ;;  %v84_v45 = vld [vmem:[%s81_s28 + $0x10] sm:$0xff]  ;;  %s1271_s8 = sld [smem:[#allocation3 + $0x3]]  ;;  %s1610_s22 = smov [#allocation9]  }
  0x30   :  { %v85_v49 = vld [vmem:[%s81_s28 + $0x18] sm:$0xff]  ;;  %s1277_s11 = sld [smem:[#allocation3 + $0x4]]  ;;  %s1196_s23 = sshll.u32 %s1610_s22, 4  ;;  %s1197_s23 = int_to_ptr.vmem [resolvable:$true] %s1196_s23 }
  0x31   :  { %253 = vmatpush1.bf16.msra.mxu0 %v1673_v12  ;;  %294 = vmatpush1.bf16.msra.mxu1 %v1693_v19  ;;  %s1283_s14 = sld [smem:[#allocation3 + $0x5]]  ;;  %s1574_s24 = scalar_lea.vmem %s1197_s23, 128 }
  0x32   :  { %254 = vmatprep.subr.bf16.mxu0 %v1675_v13  ;;  %295 = vmatprep.subr.bf16.mxu1 %v1696_v20  ;;  %s1289_s17 = sld [smem:[#allocation3 + $0x6]]  ;;  %p1575_p10 = scmp.ne.s32.totalorder %s1197_s23, %s1574_s24 }
  0x33   :  { %s1302_s30 = sshll.u32 %s1259_s29, 5  ;;  %s1295_s20 = sld [smem:[#allocation3 + $0x7]] }
  0x34   :  { %s359_s4 = scalar_lea.vmem [#allocation4], %s1302_s30  ;;  %s1303_s6 = sshll.u32 %s1265_s5, 5 }
  0x35   :  { %255 = vmatpush1.bf16.msra.mxu0 %v1687_v17  ;;  %296 = vmatpush1.bf16.msra.mxu1 %v1705_v23  ;;  %s478_s7 = scalar_lea.vmem [#allocation4], %s1303_s6  ;;  %s1304_s9 = sshll.u32 %s1271_s8, 5 }
  0x36   :  { %256 = vmatprep.subr.bf16.mxu0 %v1690_v18  ;;  %297 = vmatprep.subr.bf16.mxu1 %v1708_v24  ;;  %s597_s10 = scalar_lea.vmem [#allocation4], %s1304_s9  ;;  %s1305_s12 = sshll.u32 %s1277_s11, 5 }
  0x37   :  { %s716_s13 = scalar_lea.vmem [#allocation4], %s1305_s12  ;;  %s1306_s15 = sshll.u32 %s1283_s14, 5 }
  0x38   :  { %s835_s16 = scalar_lea.vmem [#allocation4], %s1306_s15  ;;  %s1307_s18 = sshll.u32 %s1289_s17, 5 }
  0x39   :  { %257 = vmatpush1.bf16.msra.mxu0 %v1699_v21  ;;  %298 = vmatpush1.bf16.msra.mxu1 %v1717_v27  ;;  %s954_s19 = scalar_lea.vmem [#allocation4], %s1307_s18  ;;  %s1308_s0 = sshll.u32 %s1295_s20, 5 }
  0x3a   :  { %258 = vmatprep.subr.bf16.mxu0 %v1701_v22  ;;  %299 = vmatprep.subr.bf16.mxu1 %v1720_v28  ;;  %s1073_s21 = scalar_lea.vmem [#allocation4], %s1308_s0  ;;  %p1579_p11 = scmp.lt.s32.totalorder %s1197_s23, %s1197_s23 }
  0x3b   :  { %p1580_p12 = scmp.lt.s32.totalorder %s1574_s24, %s1574_s24 }
  0x3d   :  { %259 = vmatpush1.bf16.msra.mxu0 %v1711_v25  ;;  %300 = vmatpush1.bf16.msra.mxu1 %v1727_v30  ;;  %p1581_p13 = por %p1580_p12, %p1579_p11 }
  0x3e   :  { %260 = vmatprep.subr.bf16.mxu0 %v1714_v26  ;;  %301 = vmatprep.subr.bf16.mxu1 %v1730_v31 }
  0x3f   :  { %p1582_p0 = pnand %p1581_p13, %p1575_p10 }
  0x41   :  { %261 = vmatpush1.bf16.msra.mxu0 %v1723_v29  ;;  %302 = vmatpush1.bf16.msra.mxu1 %v1734_v32 }
  0x42   :  { %365 = vmatprep.subr.bf16.mxu0 %v1642_v1  ;;  %406 = vmatprep.subr.bf16.mxu1 %v1655_v6 }
  0x44   :  { %279 = vmatmul.mubr.bf16.vlgmr.msra.gmra.mxu0 %v1609_v0  ;;  %320 = vmatmul.mubr.bf16.vlgmr.msra.gmra.mxu1 %v1609_v0 }
  0x45   :  { %366 = vmatpush1.bf16.msra.mxu0 %v1644_v2  ;;  %397 = vmatprep.mubr.bf16.mxu0 %v1609_v0 }
  0x46   :  { %367 = vmatprep.subr.bf16.mxu0 %v1647_v3  ;;  %407 = vmatpush1.bf16.msra.mxu1 %v1657_v7 }
  0x47   :  { %408 = vmatprep.subr.bf16.mxu1 %v1667_v10  ;;  %438 = vmatprep.mubr.bf16.mxu1 %v1609_v0 }
  0x49   :  { %368 = vmatpush1.bf16.msra.mxu0 %v1650_v4 }
  0x4a   :  { %369 = vmatprep.subr.bf16.mxu0 %v1653_v5  ;;  %409 = vmatpush1.bf16.msra.mxu1 %v1669_v11 }
  0x4b   :  { %410 = vmatprep.subr.bf16.mxu1 %v1677_v14 }
  0x4d   :  { %370 = vmatpush1.bf16.msra.mxu0 %v1660_v8 }
  0x4e   :  { %371 = vmatprep.subr.bf16.mxu0 %v1664_v9  ;;  %411 = vmatpush1.bf16.msra.mxu1 %v1681_v15 }
  0x4f   :  { %412 = vmatprep.subr.bf16.mxu1 %v1684_v16 }
  0x51   :  { %372 = vmatpush1.bf16.msra.mxu0 %v1673_v12 }
  0x52   :  { %373 = vmatprep.subr.bf16.mxu0 %v1675_v13  ;;  %413 = vmatpush1.bf16.msra.mxu1 %v1693_v19 }
  0x53   :  { %414 = vmatprep.subr.bf16.mxu1 %v1696_v20 }
  0x55   :  { %374 = vmatpush1.bf16.msra.mxu0 %v1687_v17 }
  0x56   :  { %375 = vmatprep.subr.bf16.mxu0 %v1690_v18  ;;  %415 = vmatpush1.bf16.msra.mxu1 %v1705_v23 }
  0x57   :  { %416 = vmatprep.subr.bf16.mxu1 %v1708_v24 }
  0x59   :  { %376 = vmatpush1.bf16.msra.mxu0 %v1699_v21 }
  0x5a   :  { %377 = vmatprep.subr.bf16.mxu0 %v1701_v22  ;;  %417 = vmatpush1.bf16.msra.mxu1 %v1717_v27 }
  0x5b   :  { %418 = vmatprep.subr.bf16.mxu1 %v1720_v28 }
  0x5d   :  { %378 = vmatpush1.bf16.msra.mxu0 %v1711_v25 }
  0x5e   :  { %379 = vmatprep.subr.bf16.mxu0 %v1714_v26  ;;  %419 = vmatpush1.bf16.msra.mxu1 %v1727_v30 }
  0x5f   :  { %420 = vmatprep.subr.bf16.mxu1 %v1730_v31 }
  0x61   :  { %380 = vmatpush1.bf16.msra.mxu0 %v1723_v29 }
  0x62   :  { %484 = vmatprep.subr.bf16.mxu0 %v1642_v1  ;;  %421 = vmatpush1.bf16.msra.mxu1 %v1734_v32 }
  0x63   :  { %525 = vmatprep.subr.bf16.mxu1 %v1655_v6 }
 0x104   :  { %v280_v34 = vpop.f32.mrf.mxu0  ;;  %v321_v42 = vpop.f32.mrf.mxu1 }
 0x105   :  { %v328_v36 = vadd.f32 %v280_v34, %v82_v33  ;;  %v330_v47 = vadd.f32 %v321_v42, %v84_v45 }
 0x106   :  { %v282_v37 = vpop.f32.mrf.mxu0  ;;  %v323_v44 = vpop.f32.mrf.mxu1 }
 0x107   :  { %v1256_v38 = vmul.f32 -1.442695, %v328_v36  ;;  %v329_v39 = vadd.f32 %v282_v37, %v83_v35  ;;  %v1258_v50 = vmul.f32 -1.442695, %v330_v47  ;;  %v331_v51 = vadd.f32 %v323_v44, %v85_v49  ;;  %v360_v37 = vld [vmem:[%s359_s4] sm:$0xff] }
 0x108   :  { %v284_v40 = vpop.f32.mrf.mxu0  ;;  %v325_v46 = vpop.f32.mrf.mxu1 }
 0x109   :  { %1366 = vpow2.f32 %v1256_v38  ;;  %v1257_v41 = vmul.f32 -1.442695, %v329_v39  ;;  %v361_v40 = vld [vmem:[%s359_s4 + $0x8] sm:$0xff] }
 0x10a   :  { %v285_v43 = vpop.f32.mrf.mxu0  ;;  %v326_v48 = vpop.f32.mrf.mxu1 }
 0x10b   :  { %1368 = vpow2.f32 %v1257_v41 }
 0x10c   :  { %1370 = vpow2.f32 %v1258_v50 }
 0x10d   :  { %1372 = vtanh.f32 %v331_v51  ;;  %v362_v51 = vld [vmem:[%s359_s4 + $0x10] sm:$0xff] }
 0x116   :  { %v1367_v52 = vpop.eup %1366 }
 0x117   :  { %v341_v53 = vadd.f32 1.0, %v1367_v52 }
 0x118   :  { %v1369_v54 = vpop.eup %1368 }
 0x119   :  { %1374 = vrcp.f32 %v341_v53  ;;  %v342_v55 = vadd.f32 1.0, %v1369_v54  ;;  %v1371_v56 = vpop.eup %1370  ;;  %v363_v53 = vld [vmem:[%s359_s4 + $0x18] sm:$0xff] }
 0x11a   :  { %v1373_v57 = vpop.eup %1372  ;;  %v343_v60 = vadd.f32 1.0, %v1371_v56 }
 0x11b   :  { %1376 = vrcp.f32 %v342_v55 }
 0x11c   :  { %1378 = vrcp.f32 %v343_v60 }
 0x126   :  { %v1375_v58 = vpop.eup %1374 }
 0x127   :  { %v352_v62 = vmul.f32 %v1375_v58, %v1373_v57 }
 0x128   :  { %v1377_v59 = vpop.eup %1376 }
 0x129   :  { %v351_v61 = vmul.f32 0.0, %v1377_v59  ;;  %v1379_v33 = vpop.eup %1378 }
 0x12b   :  { %v1776_v63 = vadd.f32 %v352_v62, %v351_v61 }
 0x12d   :  { %1380 = vtanh.f32 %v1776_v63 }
 0x13a   :  { %v1381_v34 = vpop.eup %1380 }
 0x13b   :  { %v355_v35 = vmul.f32 %v1381_v34, %v1379_v33 }
 0x13d   :  { %v364_v36 = vpack.c.bf16 %v355_v35, %v355_v35 }
 0x13f   :  { %398 = vmatmul.mubr.bf16.vlgmr.msra.gmra.mxu0 %v364_v36  ;;  %439 = vmatmul.mubr.bf16.vlgmr.msra.gmra.mxu1 %v364_v36 }
 0x140   :  { %485 = vmatpush1.bf16.msra.mxu0 %v1644_v2  ;;  %526 = vmatpush1.bf16.msra.mxu1 %v1657_v7 }
 0x141   :  { %486 = vmatprep.subr.bf16.mxu0 %v1647_v3  ;;  %527 = vmatprep.subr.bf16.mxu1 %v1667_v10 }
 0x142   :  { %516 = vmatprep.mubr.bf16.mxu0 %v1609_v0  ;;  %557 = vmatprep.mubr.bf16.mxu1 %v1609_v0 }
 0x144   :  { %487 = vmatpush1.bf16.msra.mxu0 %v1650_v4  ;;  %528 = vmatpush1.bf16.msra.mxu1 %v1669_v11 }
 0x145   :  { %488 = vmatprep.subr.bf16.mxu0 %v1653_v5  ;;  %529 = vmatprep.subr.bf16.mxu1 %v1677_v14 }
 0x148   :  { %489 = vmatpush1.bf16.msra.mxu0 %v1660_v8  ;;  %530 = vmatpush1.bf16.msra.mxu1 %v1681_v15 }
 0x149   :  { %490 = vmatprep.subr.bf16.mxu0 %v1664_v9  ;;  %531 = vmatprep.subr.bf16.mxu1 %v1684_v16 }
 0x14c   :  { %491 = vmatpush1.bf16.msra.mxu0 %v1673_v12  ;;  %532 = vmatpush1.bf16.msra.mxu1 %v1693_v19 }
 0x14d   :  { %492 = vmatprep.subr.bf16.mxu0 %v1675_v13  ;;  %533 = vmatprep.subr.bf16.mxu1 %v1696_v20 }
 0x150   :  { %493 = vmatpush1.bf16.msra.mxu0 %v1687_v17  ;;  %534 = vmatpush1.bf16.msra.mxu1 %v1705_v23 }
 0x151   :  { %494 = vmatprep.subr.bf16.mxu0 %v1690_v18  ;;  %535 = vmatprep.subr.bf16.mxu1 %v1708_v24 }
 0x154   :  { %495 = vmatpush1.bf16.msra.mxu0 %v1699_v21  ;;  %536 = vmatpush1.bf16.msra.mxu1 %v1717_v27 }
 0x155   :  { %496 = vmatprep.subr.bf16.mxu0 %v1701_v22  ;;  %537 = vmatprep.subr.bf16.mxu1 %v1720_v28 }
 0x158   :  { %497 = vmatpush1.bf16.msra.mxu0 %v1711_v25  ;;  %538 = vmatpush1.bf16.msra.mxu1 %v1727_v30 }
 0x159   :  { %498 = vmatprep.subr.bf16.mxu0 %v1714_v26  ;;  %539 = vmatprep.subr.bf16.mxu1 %v1730_v31 }
 0x15c   :  { %499 = vmatpush1.bf16.msra.mxu0 %v1723_v29  ;;  %540 = vmatpush1.bf16.msra.mxu1 %v1734_v32 }
 0x15d   :  { %603 = vmatprep.subr.bf16.mxu0 %v1642_v1  ;;  %644 = vmatprep.subr.bf16.mxu1 %v1655_v6 }
 0x1ff   :  { %v399_v38 = vpop.f32.mrf.mxu0  ;;  %v440_v39 = vpop.f32.mrf.mxu1 }
 0x200   :  { %v447_v41 = vadd.f32 %v399_v38, %v360_v37  ;;  %v449_v52 = vadd.f32 %v440_v39, %v362_v51 }
 0x201   :  { %v401_v42 = vpop.f32.mrf.mxu0  ;;  %v442_v43 = vpop.f32.mrf.mxu1 }
 0x202   :  { %v1262_v44 = vmul.f32 -1.442695, %v447_v41  ;;  %v448_v45 = vadd.f32 %v401_v42, %v361_v40  ;;  %v1264_v54 = vmul.f32 -1.442695, %v449_v52  ;;  %v450_v56 = vadd.f32 %v442_v43, %v363_v53 }
 0x203   :  { %v403_v46 = vpop.f32.mrf.mxu0  ;;  %v444_v47 = vpop.f32.mrf.mxu1 }
 0x204   :  { %1382 = vpow2.f32 %v1262_v44  ;;  %v1263_v48 = vmul.f32 -1.442695, %v448_v45  ;;  %v480_v44 = vld [vmem:[%s478_s7 + $0x8] sm:$0xff] }
 0x205   :  { %v404_v49 = vpop.f32.mrf.mxu0  ;;  %v445_v50 = vpop.f32.mrf.mxu1 }
 0x206   :  { %1384 = vpow2.f32 %v1263_v48 }
 0x207   :  { %1386 = vpow2.f32 %v1264_v54 }
 0x211   :  { %v1383_v55 = vpop.eup %1382 }
 0x212   :  { %v460_v57 = vadd.f32 1.0, %v1383_v55  ;;  %v481_v55 = vld [vmem:[%s478_s7 + $0x10] sm:$0xff] }
 0x213   :  { %v1385_v58 = vpop.eup %1384 }
 0x214   :  { %1388 = vrcp.f32 %v460_v57  ;;  %v461_v59 = vadd.f32 1.0, %v1385_v58  ;;  %v1387_v60 = vpop.eup %1386  ;;  %v482_v57 = vld [vmem:[%s478_s7 + $0x18] sm:$0xff] }
 0x215   :  { %1390 = vtanh.f32 %v450_v56  ;;  %v462_v34 = vadd.f32 1.0, %v1387_v60 }
 0x216   :  { %1392 = vrcp.f32 %v461_v59 }
 0x217   :  { %1394 = vrcp.f32 %v462_v34 }
 0x221   :  { %v1389_v61 = vpop.eup %1388 }
 0x222   :  { %v1391_v62 = vpop.eup %1390 }
 0x223   :  { %v1393_v33 = vpop.eup %1392  ;;  %v471_v36 = vmul.f32 %v1391_v62, %v1389_v61 }
 0x224   :  { %v470_v35 = vmul.f32 %v1393_v33, %v1776_v63  ;;  %v1395_v38 = vpop.eup %1394  ;;  %v479_v63 = vld [vmem:[%s478_s7] sm:$0xff] }
 0x226   :  { %v1814_v37 = vadd.f32 %v471_v36, %v470_v35 }
 0x228   :  { %1396 = vtanh.f32 %v1814_v37 }
 0x235   :  { %v1397_v39 = vpop.eup %1396 }
 0x236   :  { %v474_v40 = vmul.f32 %v1397_v39, %v1395_v38 }
 0x238   :  { %v483_v41 = vpack.c.bf16 %v474_v40, %v474_v40 }
 0x23a   :  { %517 = vmatmul.mubr.bf16.vlgmr.msra.gmra.mxu0 %v483_v41  ;;  %558 = vmatmul.mubr.bf16.vlgmr.msra.gmra.mxu1 %v483_v41 }
 0x23b   :  { %604 = vmatpush1.bf16.msra.mxu0 %v1644_v2  ;;  %645 = vmatpush1.bf16.msra.mxu1 %v1657_v7 }
 0x23c   :  { %605 = vmatprep.subr.bf16.mxu0 %v1647_v3  ;;  %646 = vmatprep.subr.bf16.mxu1 %v1667_v10 }
 0x23d   :  { %635 = vmatprep.mubr.bf16.mxu0 %v1609_v0  ;;  %676 = vmatprep.mubr.bf16.mxu1 %v1609_v0 }
 0x23f   :  { %606 = vmatpush1.bf16.msra.mxu0 %v1650_v4  ;;  %647 = vmatpush1.bf16.msra.mxu1 %v1669_v11 }
 0x240   :  { %607 = vmatprep.subr.bf16.mxu0 %v1653_v5  ;;  %648 = vmatprep.subr.bf16.mxu1 %v1677_v14 }
 0x243   :  { %608 = vmatpush1.bf16.msra.mxu0 %v1660_v8  ;;  %649 = vmatpush1.bf16.msra.mxu1 %v1681_v15 }
 0x244   :  { %609 = vmatprep.subr.bf16.mxu0 %v1664_v9  ;;  %650 = vmatprep.subr.bf16.mxu1 %v1684_v16 }
 0x247   :  { %610 = vmatpush1.bf16.msra.mxu0 %v1673_v12  ;;  %651 = vmatpush1.bf16.msra.mxu1 %v1693_v19 }
 0x248   :  { %611 = vmatprep.subr.bf16.mxu0 %v1675_v13  ;;  %652 = vmatprep.subr.bf16.mxu1 %v1696_v20 }
 0x24b   :  { %612 = vmatpush1.bf16.msra.mxu0 %v1687_v17  ;;  %653 = vmatpush1.bf16.msra.mxu1 %v1705_v23 }
 0x24c   :  { %613 = vmatprep.subr.bf16.mxu0 %v1690_v18  ;;  %654 = vmatprep.subr.bf16.mxu1 %v1708_v24 }
 0x24f   :  { %614 = vmatpush1.bf16.msra.mxu0 %v1699_v21  ;;  %655 = vmatpush1.bf16.msra.mxu1 %v1717_v27 }
 0x250   :  { %615 = vmatprep.subr.bf16.mxu0 %v1701_v22  ;;  %656 = vmatprep.subr.bf16.mxu1 %v1720_v28 }
 0x253   :  { %616 = vmatpush1.bf16.msra.mxu0 %v1711_v25  ;;  %657 = vmatpush1.bf16.msra.mxu1 %v1727_v30 }
 0x254   :  { %617 = vmatprep.subr.bf16.mxu0 %v1714_v26  ;;  %658 = vmatprep.subr.bf16.mxu1 %v1730_v31 }
 0x257   :  { %618 = vmatpush1.bf16.msra.mxu0 %v1723_v29  ;;  %659 = vmatpush1.bf16.msra.mxu1 %v1734_v32 }
 0x258   :  { %722 = vmatprep.subr.bf16.mxu0 %v1642_v1  ;;  %763 = vmatprep.subr.bf16.mxu1 %v1655_v6 }
 0x2fa   :  { %v518_v42 = vpop.f32.mrf.mxu0  ;;  %v559_v43 = vpop.f32.mrf.mxu1 }
 0x2fb   :  { %v566_v45 = vadd.f32 %v518_v42, %v479_v63  ;;  %v568_v56 = vadd.f32 %v559_v43, %v481_v55 }
 0x2fc   :  { %v520_v46 = vpop.f32.mrf.mxu0  ;;  %v561_v47 = vpop.f32.mrf.mxu1 }
 0x2fd   :  { %v1268_v48 = vmul.f32 -1.442695, %v566_v45  ;;  %v567_v49 = vadd.f32 %v520_v46, %v480_v44  ;;  %v1270_v58 = vmul.f32 -1.442695, %v568_v56  ;;  %v569_v60 = vadd.f32 %v561_v47, %v482_v57 }
 0x2fe   :  { %v522_v50 = vpop.f32.mrf.mxu0  ;;  %v563_v51 = vpop.f32.mrf.mxu1 }
 0x2ff   :  { %1398 = vpow2.f32 %v1268_v48  ;;  %v1269_v52 = vmul.f32 -1.442695, %v567_v49  ;;  %v599_v48 = vld [vmem:[%s597_s10 + $0x8] sm:$0xff] }
 0x300   :  { %v523_v53 = vpop.f32.mrf.mxu0  ;;  %v564_v54 = vpop.f32.mrf.mxu1 }
 0x301   :  { %1400 = vpow2.f32 %v1269_v52 }
 0x302   :  { %1402 = vpow2.f32 %v1270_v58 }
 0x30c   :  { %v1399_v59 = vpop.eup %1398 }
 0x30d   :  { %v579_v61 = vadd.f32 1.0, %v1399_v59  ;;  %v600_v59 = vld [vmem:[%s597_s10 + $0x10] sm:$0xff] }
 0x30e   :  { %v1401_v62 = vpop.eup %1400 }
 0x30f   :  { %1404 = vrcp.f32 %v579_v61  ;;  %v580_v33 = vadd.f32 1.0, %v1401_v62  ;;  %v1403_v34 = vpop.eup %1402  ;;  %v601_v61 = vld [vmem:[%s597_s10 + $0x18] sm:$0xff] }
 0x310   :  { %1406 = vtanh.f32 %v569_v60  ;;  %v581_v39 = vadd.f32 1.0, %v1403_v34 }
 0x311   :  { %1408 = vrcp.f32 %v580_v33 }
 0x312   :  { %1410 = vrcp.f32 %v581_v39 }
 0x31c   :  { %v1405_v35 = vpop.eup %1404 }
 0x31d   :  { %v1407_v36 = vpop.eup %1406 }
 0x31e   :  { %v1409_v38 = vpop.eup %1408  ;;  %v590_v41 = vmul.f32 %v1407_v36, %v1405_v35 }
 0x31f   :  { %v589_v40 = vmul.f32 %v1409_v38, %v1814_v37  ;;  %v1411_v42 = vpop.eup %1410  ;;  %v598_v37 = vld [vmem:[%s597_s10] sm:$0xff] }
 0x321   :  { %v1852_v63 = vadd.f32 %v590_v41, %v589_v40 }
 0x323   :  { %1412 = vtanh.f32 %v1852_v63 }
 0x330   :  { %v1413_v43 = vpop.eup %1412 }
 0x331   :  { %v593_v44 = vmul.f32 %v1413_v43, %v1411_v42 }
 0x333   :  { %v602_v45 = vpack.c.bf16 %v593_v44, %v593_v44 }
 0x335   :  { %636 = vmatmul.mubr.bf16.vlgmr.msra.gmra.mxu0 %v602_v45  ;;  %677 = vmatmul.mubr.bf16.vlgmr.msra.gmra.mxu1 %v602_v45 }
 0x336   :  { %723 = vmatpush1.bf16.msra.mxu0 %v1644_v2  ;;  %764 = vmatpush1.bf16.msra.mxu1 %v1657_v7 }
 0x337   :  { %724 = vmatprep.subr.bf16.mxu0 %v1647_v3  ;;  %765 = vmatprep.subr.bf16.mxu1 %v1667_v10 }
 0x338   :  { %754 = vmatprep.mubr.bf16.mxu0 %v1609_v0  ;;  %795 = vmatprep.mubr.bf16.mxu1 %v1609_v0 }
 0x33a   :  { %725 = vmatpush1.bf16.msra.mxu0 %v1650_v4  ;;  %766 = vmatpush1.bf16.msra.mxu1 %v1669_v11 }
 0x33b   :  { %726 = vmatprep.subr.bf16.mxu0 %v1653_v5  ;;  %767 = vmatprep.subr.bf16.mxu1 %v1677_v14 }
 0x33e   :  { %727 = vmatpush1.bf16.msra.mxu0 %v1660_v8  ;;  %768 = vmatpush1.bf16.msra.mxu1 %v1681_v15 }
 0x33f   :  { %728 = vmatprep.subr.bf16.mxu0 %v1664_v9  ;;  %769 = vmatprep.subr.bf16.mxu1 %v1684_v16 }
 0x342   :  { %729 = vmatpush1.bf16.msra.mxu0 %v1673_v12  ;;  %770 = vmatpush1.bf16.msra.mxu1 %v1693_v19 }
 0x343   :  { %730 = vmatprep.subr.bf16.mxu0 %v1675_v13  ;;  %771 = vmatprep.subr.bf16.mxu1 %v1696_v20 }
 0x346   :  { %731 = vmatpush1.bf16.msra.mxu0 %v1687_v17  ;;  %772 = vmatpush1.bf16.msra.mxu1 %v1705_v23 }
 0x347   :  { %732 = vmatprep.subr.bf16.mxu0 %v1690_v18  ;;  %773 = vmatprep.subr.bf16.mxu1 %v1708_v24 }
 0x34a   :  { %733 = vmatpush1.bf16.msra.mxu0 %v1699_v21  ;;  %774 = vmatpush1.bf16.msra.mxu1 %v1717_v27 }
 0x34b   :  { %734 = vmatprep.subr.bf16.mxu0 %v1701_v22  ;;  %775 = vmatprep.subr.bf16.mxu1 %v1720_v28 }
 0x34e   :  { %735 = vmatpush1.bf16.msra.mxu0 %v1711_v25  ;;  %776 = vmatpush1.bf16.msra.mxu1 %v1727_v30 }
 0x34f   :  { %736 = vmatprep.subr.bf16.mxu0 %v1714_v26  ;;  %777 = vmatprep.subr.bf16.mxu1 %v1730_v31 }
 0x352   :  { %737 = vmatpush1.bf16.msra.mxu0 %v1723_v29  ;;  %778 = vmatpush1.bf16.msra.mxu1 %v1734_v32 }
 0x353   :  { %841 = vmatprep.subr.bf16.mxu0 %v1642_v1  ;;  %882 = vmatprep.subr.bf16.mxu1 %v1655_v6 }
 0x3f5   :  { %v637_v46 = vpop.f32.mrf.mxu0  ;;  %v678_v47 = vpop.f32.mrf.mxu1 }
 0x3f6   :  { %v685_v49 = vadd.f32 %v637_v46, %v598_v37  ;;  %v687_v60 = vadd.f32 %v678_v47, %v600_v59 }
 0x3f7   :  { %v639_v50 = vpop.f32.mrf.mxu0  ;;  %v680_v51 = vpop.f32.mrf.mxu1 }
 0x3f8   :  { %v1274_v52 = vmul.f32 -1.442695, %v685_v49  ;;  %v686_v53 = vadd.f32 %v639_v50, %v599_v48  ;;  %v1276_v62 = vmul.f32 -1.442695, %v687_v60  ;;  %v688_v34 = vadd.f32 %v680_v51, %v601_v61 }
 0x3f9   :  { %v641_v54 = vpop.f32.mrf.mxu0  ;;  %v682_v55 = vpop.f32.mrf.mxu1 }
 0x3fa   :  { %1414 = vpow2.f32 %v1274_v52  ;;  %v1275_v56 = vmul.f32 -1.442695, %v686_v53  ;;  %v718_v52 = vld [vmem:[%s716_s13 + $0x8] sm:$0xff] }
 0x3fb   :  { %v642_v57 = vpop.f32.mrf.mxu0  ;;  %v683_v58 = vpop.f32.mrf.mxu1 }
 0x3fc   :  { %1416 = vpow2.f32 %v1275_v56 }
 0x3fd   :  { %1418 = vpow2.f32 %v1276_v62 }
 0x407   :  { %v1415_v33 = vpop.eup %1414 }
 0x408   :  { %v698_v35 = vadd.f32 1.0, %v1415_v33  ;;  %v720_v33 = vld [vmem:[%s716_s13 + $0x18] sm:$0xff] }
 0x409   :  { %v1417_v36 = vpop.eup %1416 }
 0x40a   :  { %1420 = vrcp.f32 %v698_v35  ;;  %v699_v38 = vadd.f32 1.0, %v1417_v36  ;;  %v1419_v39 = vpop.eup %1418 }
 0x40b   :  { %1422 = vtanh.f32 %v688_v34  ;;  %v700_v43 = vadd.f32 1.0, %v1419_v39 }
 0x40c   :  { %1424 = vrcp.f32 %v699_v38 }
 0x40d   :  { %1426 = vrcp.f32 %v700_v43 }
 0x417   :  { %v1421_v40 = vpop.eup %1420 }
 0x418   :  { %v1423_v41 = vpop.eup %1422 }
 0x419   :  { %v1425_v42 = vpop.eup %1424  ;;  %v709_v45 = vmul.f32 %v1423_v41, %v1421_v40 }
 0x41a   :  { %v708_v44 = vmul.f32 %v1425_v42, %v1852_v63  ;;  %v1427_v46 = vpop.eup %1426  ;;  %v717_v63 = vld [vmem:[%s716_s13] sm:$0xff] }
 0x41c   :  { %v1890_v37 = vadd.f32 %v709_v45, %v708_v44 }
 0x41e   :  { %1428 = vtanh.f32 %v1890_v37 }
 0x42b   :  { %v1429_v47 = vpop.eup %1428 }
 0x42c   :  { %v712_v48 = vmul.f32 %v1429_v47, %v1427_v46 }
 0x42e   :  { %v721_v49 = vpack.c.bf16 %v712_v48, %v712_v48 }
 0x430   :  { %755 = vmatmul.mubr.bf16.vlgmr.msra.gmra.mxu0 %v721_v49  ;;  %796 = vmatmul.mubr.bf16.vlgmr.msra.gmra.mxu1 %v721_v49 }
 0x431   :  { %842 = vmatpush1.bf16.msra.mxu0 %v1644_v2  ;;  %883 = vmatpush1.bf16.msra.mxu1 %v1657_v7 }
 0x432   :  { %843 = vmatprep.subr.bf16.mxu0 %v1647_v3  ;;  %884 = vmatprep.subr.bf16.mxu1 %v1667_v10 }
 0x433   :  { %873 = vmatprep.mubr.bf16.mxu0 %v1609_v0  ;;  %914 = vmatprep.mubr.bf16.mxu1 %v1609_v0 }
 0x435   :  { %844 = vmatpush1.bf16.msra.mxu0 %v1650_v4  ;;  %885 = vmatpush1.bf16.msra.mxu1 %v1669_v11 }
 0x436   :  { %845 = vmatprep.subr.bf16.mxu0 %v1653_v5  ;;  %886 = vmatprep.subr.bf16.mxu1 %v1677_v14 }
 0x439   :  { %846 = vmatpush1.bf16.msra.mxu0 %v1660_v8  ;;  %887 = vmatpush1.bf16.msra.mxu1 %v1681_v15 }
 0x43a   :  { %847 = vmatprep.subr.bf16.mxu0 %v1664_v9  ;;  %888 = vmatprep.subr.bf16.mxu1 %v1684_v16 }
 0x43d   :  { %848 = vmatpush1.bf16.msra.mxu0 %v1673_v12  ;;  %889 = vmatpush1.bf16.msra.mxu1 %v1693_v19 }
 0x43e   :  { %849 = vmatprep.subr.bf16.mxu0 %v1675_v13  ;;  %890 = vmatprep.subr.bf16.mxu1 %v1696_v20 }
 0x441   :  { %850 = vmatpush1.bf16.msra.mxu0 %v1687_v17  ;;  %891 = vmatpush1.bf16.msra.mxu1 %v1705_v23 }
 0x442   :  { %851 = vmatprep.subr.bf16.mxu0 %v1690_v18  ;;  %892 = vmatprep.subr.bf16.mxu1 %v1708_v24 }
 0x445   :  { %852 = vmatpush1.bf16.msra.mxu0 %v1699_v21  ;;  %893 = vmatpush1.bf16.msra.mxu1 %v1717_v27 }
 0x446   :  { %853 = vmatprep.subr.bf16.mxu0 %v1701_v22  ;;  %894 = vmatprep.subr.bf16.mxu1 %v1720_v28 }
 0x449   :  { %854 = vmatpush1.bf16.msra.mxu0 %v1711_v25  ;;  %895 = vmatpush1.bf16.msra.mxu1 %v1727_v30 }
 0x44a   :  { %855 = vmatprep.subr.bf16.mxu0 %v1714_v26  ;;  %896 = vmatprep.subr.bf16.mxu1 %v1730_v31 }
 0x44d   :  { %856 = vmatpush1.bf16.msra.mxu0 %v1723_v29  ;;  %897 = vmatpush1.bf16.msra.mxu1 %v1734_v32 }
 0x44e   :  { %960 = vmatprep.subr.bf16.mxu0 %v1642_v1  ;;  %1001 = vmatprep.subr.bf16.mxu1 %v1655_v6  ;;  %v719_v6 = vld [vmem:[%s716_s13 + $0x10] sm:$0xff] }
 0x4f0   :  { %v756_v50 = vpop.f32.mrf.mxu0  ;;  %v797_v51 = vpop.f32.mrf.mxu1 }
 0x4f1   :  { %v804_v53 = vadd.f32 %v756_v50, %v717_v63  ;;  %v806_v62 = vadd.f32 %v797_v51, %v719_v6  ;;  %v1501_v6 = vld [vmem:[#allocation7 + $0xc8] ss:$16 sps:$4 sm:$0xff]  }
 0x4f2   :  { %v758_v54 = vpop.f32.mrf.mxu0  ;;  %v799_v55 = vpop.f32.mrf.mxu1 }
 0x4f3   :  { %v1280_v56 = vmul.f32 -1.442695, %v804_v53  ;;  %v805_v57 = vadd.f32 %v758_v54, %v718_v52  ;;  %v1282_v34 = vmul.f32 -1.442695, %v806_v62  ;;  %v807_v36 = vadd.f32 %v799_v55, %v720_v33  ;;  %v1502_v62 = vld [vmem:[#allocation7 + $0xa4] ss:$16 sps:$4 sm:$0xff]  }
 0x4f4   :  { %v760_v58 = vpop.f32.mrf.mxu0  ;;  %v801_v59 = vpop.f32.mrf.mxu1  ;;  %v1503_v33 = vld [vmem:[#allocation7 + $0xac] ss:$16 sps:$4 sm:$0xff]  }
 0x4f5   :  { %1430 = vpow2.f32 %v1280_v56  ;;  %v1281_v60 = vmul.f32 -1.442695, %v805_v57  ;;  %v1496_v58 = vld [vmem:[#allocation7 + $0xe0] ss:$16 sps:$4 sm:$0xff]   ;;  %v1497_v59 = vld [vmem:[#allocation7 + $0xe8] ss:$16 sps:$4 sm:$0xff]  }
 0x4f6   :  { %v761_v61 = vpop.f32.mrf.mxu0  ;;  %v802_v1 = vpop.f32.mrf.mxu1 }
 0x4f7   :  { %1432 = vpow2.f32 %v1281_v60  ;;  %v1498_v60 = vld [vmem:[#allocation7 + $0xc4] ss:$16 sps:$4 sm:$0xff]   ;;  %v1499_v61 = vld [vmem:[#allocation7 + $0xcc] ss:$16 sps:$4 sm:$0xff]   ;;  %v1500_v1 = vld [vmem:[#allocation7 + $0xc0] ss:$16 sps:$4 sm:$0xff]  }
 0x4f8   :  { %1434 = vpow2.f32 %v1282_v34  ;;  %v1504_v34 = vld [vmem:[#allocation7 + $0xa0] ss:$16 sps:$4 sm:$0xff]  }
 0x502   :  { %v1431_v35 = vpop.eup %1430 }
 0x503   :  { %v817_v38 = vadd.f32 1.0, %v1431_v35  ;;  %v1505_v35 = vld [vmem:[#allocation7 + $0xa8] ss:$16 sps:$4 sm:$0xff]  }
 0x504   :  { %v1433_v39 = vpop.eup %1432 }
 0x505   :  { %1436 = vrcp.f32 %v817_v38  ;;  %v818_v40 = vadd.f32 1.0, %v1433_v39  ;;  %v1435_v41 = vpop.eup %1434  ;;  %v1507_v38 = vld [vmem:[#allocation7 + $0x8c] ss:$16 sps:$4 sm:$0xff]   ;;  %v1508_v39 = vld [vmem:[#allocation7 + $0x80] ss:$16 sps:$4 sm:$0xff]  }
 0x506   :  { %1438 = vtanh.f32 %v807_v36  ;;  %v819_v45 = vadd.f32 1.0, %v1435_v41  ;;  %v1506_v36 = vld [vmem:[#allocation7 + $0x84] ss:$16 sps:$4 sm:$0xff]   ;;  %v1511_v41 = vld [vmem:[#allocation7 + $0x6c] ss:$16 sps:$4 sm:$0xff]  }
 0x507   :  { %1440 = vrcp.f32 %v818_v40  ;;  %v1509_v40 = vld [vmem:[#allocation7 + $0x88] ss:$16 sps:$4 sm:$0xff]  }
 0x508   :  { %1442 = vrcp.f32 %v819_v45  ;;  %v1515_v45 = vld [vmem:[#allocation7 + $0x4c] ss:$16 sps:$4 sm:$0xff]  }
 0x512   :  { %v1437_v42 = vpop.eup %1436 }
 0x513   :  { %v1439_v43 = vpop.eup %1438 }
 0x514   :  { %v1441_v44 = vpop.eup %1440  ;;  %v828_v47 = vmul.f32 %v1439_v43, %v1437_v42  ;;  %v1512_v42 = vld [vmem:[#allocation7 + $0x60] ss:$16 sps:$4 sm:$0xff]   ;;  %v1513_v43 = vld [vmem:[#allocation7 + $0x68] ss:$16 sps:$4 sm:$0xff]  }
 0x515   :  { %v827_v46 = vmul.f32 %v1441_v44, %v1890_v37  ;;  %v1443_v49 = vpop.eup %1442  ;;  %v1514_v44 = vld [vmem:[#allocation7 + $0x44] ss:$16 sps:$4 sm:$0xff]  }
 0x517   :  { %v1928_v48 = vadd.f32 %v828_v47, %v827_v46  ;;  %v1516_v46 = vld [vmem:[#allocation7 + $0x40] ss:$16 sps:$4 sm:$0xff]   ;;  %v1517_v47 = vld [vmem:[#allocation7 + $0x48] ss:$16 sps:$4 sm:$0xff]  }
 0x519   :  { %1444 = vtanh.f32 %v1928_v48 }
 0x526   :  { %v1445_v63 = vpop.eup %1444 }
 0x527   :  { %v831_v50 = vmul.f32 %v1445_v63, %v1443_v49  ;;  %v1519_v49 = vld [vmem:[#allocation7 + $0x2c] ss:$16 sps:$4 sm:$0xff]   ;;  %v1520_v63 = vld [vmem:[#allocation7 + $0x20] ss:$16 sps:$4 sm:$0xff]  }
 0x529   :  { %v840_v51 = vpack.c.bf16 %v831_v50, %v831_v50  ;;  %v1521_v50 = vld [vmem:[#allocation7 + $0x28] ss:$16 sps:$4 sm:$0xff]  }
 0x52b   :  { %874 = vmatmul.mubr.bf16.vlgmr.msra.gmra.mxu0 %v840_v51  ;;  %915 = vmatmul.mubr.bf16.vlgmr.msra.gmra.mxu1 %v840_v51  ;;  %v1522_v51 = vld [vmem:[#allocation7 + $0x4] ss:$16 sps:$4 sm:$0xff]  }
 0x52c   :  { %961 = vmatpush1.bf16.msra.mxu0 %v1644_v2  ;;  %1002 = vmatpush1.bf16.msra.mxu1 %v1657_v7  ;;  %v1494_v2 = vld [vmem:[#allocation7 + $0xe4] ss:$16 sps:$4 sm:$0xff]  }
 0x52d   :  { %962 = vmatprep.subr.bf16.mxu0 %v1647_v3  ;;  %1003 = vmatprep.subr.bf16.mxu1 %v1667_v10  ;;  %v1495_v3 = vld [vmem:[#allocation7 + $0xec] ss:$16 sps:$4 sm:$0xff]  }
 0x52e   :  { %992 = vmatprep.mubr.bf16.mxu0 %v1609_v0  ;;  %1033 = vmatprep.mubr.bf16.mxu1 %v1609_v0 }
 0x530   :  { %963 = vmatpush1.bf16.msra.mxu0 %v1650_v4  ;;  %1004 = vmatpush1.bf16.msra.mxu1 %v1669_v11  ;;  %v836_v4 = vld [vmem:[%s835_s16] sm:$0xff] }
 0x531   :  { %964 = vmatprep.subr.bf16.mxu0 %v1653_v5  ;;  %1005 = vmatprep.subr.bf16.mxu1 %v1677_v14 }
 0x534   :  { %965 = vmatpush1.bf16.msra.mxu0 %v1660_v8  ;;  %1006 = vmatpush1.bf16.msra.mxu1 %v1681_v15  ;;  %v837_v8 = vld [vmem:[%s835_s16 + $0x8] sm:$0xff] }
 0x535   :  { %966 = vmatprep.subr.bf16.mxu0 %v1664_v9  ;;  %1007 = vmatprep.subr.bf16.mxu1 %v1684_v16 }
 0x538   :  { %967 = vmatpush1.bf16.msra.mxu0 %v1673_v12  ;;  %1008 = vmatpush1.bf16.msra.mxu1 %v1693_v19  ;;  %v838_v19 = vld [vmem:[%s835_s16 + $0x10] sm:$0xff] }
 0x539   :  { %968 = vmatprep.subr.bf16.mxu0 %v1675_v13  ;;  %1009 = vmatprep.subr.bf16.mxu1 %v1696_v20 }
 0x53c   :  { %969 = vmatpush1.bf16.msra.mxu0 %v1687_v17  ;;  %1010 = vmatpush1.bf16.msra.mxu1 %v1705_v23 }
 0x53d   :  { %970 = vmatprep.subr.bf16.mxu0 %v1690_v18  ;;  %1011 = vmatprep.subr.bf16.mxu1 %v1708_v24 }
 0x540   :  { %971 = vmatpush1.bf16.msra.mxu0 %v1699_v21  ;;  %1012 = vmatpush1.bf16.msra.mxu1 %v1717_v27  ;;  %v839_v21 = vld [vmem:[%s835_s16 + $0x18] sm:$0xff] }
 0x541   :  { %972 = vmatprep.subr.bf16.mxu0 %v1701_v22  ;;  %1013 = vmatprep.subr.bf16.mxu1 %v1720_v28 }
 0x544   :  { %973 = vmatpush1.bf16.msra.mxu0 %v1711_v25  ;;  %1014 = vmatpush1.bf16.msra.mxu1 %v1727_v30 }
 0x545   :  { %974 = vmatprep.subr.bf16.mxu0 %v1714_v26  ;;  %1015 = vmatprep.subr.bf16.mxu1 %v1730_v31 }
 0x548   :  { %975 = vmatpush1.bf16.msra.mxu0 %v1723_v29  ;;  %1016 = vmatpush1.bf16.msra.mxu1 %v1734_v32 }
 0x549   :  { %1079 = vmatprep.subr.bf16.mxu0 %v1494_v2  ;;  %1120 = vmatprep.subr.bf16.mxu1 %v1495_v3  ;;  %v1523_v2 = vld [vmem:[#allocation7 + $0xc] ss:$16 sps:$4 sm:$0xff]   ;;  %v1524_v3 = vld [vmem:[#allocation7] ss:$16 sps:$4 sm:$0xff]  }
 0x5eb   :  { %v875_v5 = vpop.f32.mrf.mxu0  ;;  %v916_v7 = vpop.f32.mrf.mxu1 }
 0x5ec   :  { %v923_v9 = vadd.f32 %v875_v5, %v836_v4  ;;  %v925_v20 = vadd.f32 %v916_v7, %v838_v19  ;;  %v1525_v4 = vld [vmem:[#allocation7 + $0x8] ss:$16 sps:$4 sm:$0xff]   ;;  %v955_v5 = vld [vmem:[%s954_s19] sm:$0xff] }
 0x5ed   :  { %v877_v10 = vpop.f32.mrf.mxu0  ;;  %v918_v11 = vpop.f32.mrf.mxu1 }
 0x5ee   :  { %v1286_v12 = vmul.f32 -1.442695, %v923_v9  ;;  %v924_v13 = vadd.f32 %v877_v10, %v837_v8  ;;  %v1288_v22 = vmul.f32 -1.442695, %v925_v20  ;;  %v926_v24 = vadd.f32 %v918_v11, %v839_v21  ;;  %v956_v9 = vld [vmem:[%s954_s19 + $0x8] sm:$0xff]  ;;  %v957_v20 = vld [vmem:[%s954_s19 + $0x10] sm:$0xff] }
 0x5ef   :  { %v879_v14 = vpop.f32.mrf.mxu0  ;;  %v920_v15 = vpop.f32.mrf.mxu1 }
 0x5f0   :  { %1446 = vpow2.f32 %v1286_v12  ;;  %v1287_v16 = vmul.f32 -1.442695, %v924_v13 }
 0x5f1   :  { %v880_v17 = vpop.f32.mrf.mxu0  ;;  %v921_v18 = vpop.f32.mrf.mxu1 }
 0x5f2   :  { %1448 = vpow2.f32 %v1287_v16 }
 0x5f3   :  { %1450 = vpow2.f32 %v1288_v22  ;;  %v958_v22 = vld [vmem:[%s954_s19 + $0x18] sm:$0xff] }
 0x5fd   :  { %v1447_v23 = vpop.eup %1446 }
 0x5fe   :  { %v936_v25 = vadd.f32 1.0, %v1447_v23 }
 0x5ff   :  { %v1449_v26 = vpop.eup %1448 }
 0x600   :  { %1452 = vrcp.f32 %v936_v25  ;;  %v937_v27 = vadd.f32 1.0, %v1449_v26  ;;  %v1451_v28 = vpop.eup %1450 }
 0x601   :  { %1454 = vtanh.f32 %v926_v24  ;;  %v938_v32 = vadd.f32 1.0, %v1451_v28 }
 0x602   :  { %1456 = vrcp.f32 %v937_v27 }
 0x603   :  { %1458 = vrcp.f32 %v938_v32 }
 0x60d   :  { %v1453_v29 = vpop.eup %1452 }
 0x60e   :  { %v1455_v30 = vpop.eup %1454 }
 0x60f   :  { %v1457_v31 = vpop.eup %1456  ;;  %v947_v52 = vmul.f32 %v1455_v30, %v1453_v29 }
 0x610   :  { %v946_v37 = vmul.f32 %v1457_v31, %v1928_v48  ;;  %v1459_v54 = vpop.eup %1458  ;;  %v1518_v48 = vld [vmem:[#allocation7 + $0x24] ss:$16 sps:$4 sm:$0xff]  }
 0x612   :  { %v1964_v53 = vadd.f32 %v947_v52, %v946_v37 }
 0x614   :  { %1460 = vtanh.f32 %v1964_v53 }
 0x621   :  { %v1461_v55 = vpop.eup %1460 }
 0x622   :  { %v950_v56 = vmul.f32 %v1461_v55, %v1459_v54 }
 0x624   :  { %v959_v57 = vpack.c.bf16 %v950_v56, %v950_v56 }
 0x626   :  { %993 = vmatmul.mubr.bf16.vlgmr.msra.gmra.mxu0 %v959_v57  ;;  %1034 = vmatmul.mubr.bf16.vlgmr.msra.gmra.mxu1 %v959_v57 }
 0x627   :  { %1080 = vmatpush1.bf16.msra.mxu0 %v1496_v58  ;;  %1121 = vmatpush1.bf16.msra.mxu1 %v1497_v59 }
 0x628   :  { %1081 = vmatprep.subr.bf16.mxu0 %v1498_v60  ;;  %1122 = vmatprep.subr.bf16.mxu1 %v1499_v61  ;;  %v1074_v60 = vld [vmem:[%s1073_s21] sm:$0xff] }
 0x629   :  { %1111 = vmatprep.mubr.bf16.mxu0 %v1609_v0  ;;  %1152 = vmatprep.mubr.bf16.mxu1 %v1609_v0  ;;  %v1510_v0 = vld [vmem:[#allocation7 + $0x64] ss:$16 sps:$4 sm:$0xff]  }
 0x62b   :  { %1082 = vmatpush1.bf16.msra.mxu0 %v1500_v1  ;;  %1123 = vmatpush1.bf16.msra.mxu1 %v1501_v6  ;;  %v1075_v6 = vld [vmem:[%s1073_s21 + $0x8] sm:$0xff] }
 0x62c   :  { %1083 = vmatprep.subr.bf16.mxu0 %v1502_v62  ;;  %1124 = vmatprep.subr.bf16.mxu1 %v1503_v33 }
 0x62f   :  { %1084 = vmatpush1.bf16.msra.mxu0 %v1504_v34  ;;  %1125 = vmatpush1.bf16.msra.mxu1 %v1505_v35 }
 0x630   :  { %1085 = vmatprep.subr.bf16.mxu0 %v1506_v36  ;;  %1126 = vmatprep.subr.bf16.mxu1 %v1507_v38 }
 0x633   :  { %1086 = vmatpush1.bf16.msra.mxu0 %v1508_v39  ;;  %1127 = vmatpush1.bf16.msra.mxu1 %v1509_v40 }
 0x634   :  { %1087 = vmatprep.subr.bf16.mxu0 %v1510_v0  ;;  %1128 = vmatprep.subr.bf16.mxu1 %v1511_v41  ;;  %v1076_v41 = vld [vmem:[%s1073_s21 + $0x10] sm:$0xff] }
 0x637   :  { %1088 = vmatpush1.bf16.msra.mxu0 %v1512_v42  ;;  %1129 = vmatpush1.bf16.msra.mxu1 %v1513_v43  ;;  %v1077_v43 = vld [vmem:[%s1073_s21 + $0x18] sm:$0xff] }
 0x638   :  { %1089 = vmatprep.subr.bf16.mxu0 %v1514_v44  ;;  %1130 = vmatprep.subr.bf16.mxu1 %v1515_v45 }
 0x63b   :  { %1090 = vmatpush1.bf16.msra.mxu0 %v1516_v46  ;;  %1131 = vmatpush1.bf16.msra.mxu1 %v1517_v47 }
 0x63c   :  { %1091 = vmatprep.subr.bf16.mxu0 %v1518_v48  ;;  %1132 = vmatprep.subr.bf16.mxu1 %v1519_v49 }
 0x63f   :  { %1092 = vmatpush1.bf16.msra.mxu0 %v1520_v63  ;;  %1133 = vmatpush1.bf16.msra.mxu1 %v1521_v50 }
 0x640   :  { %1093 = vmatprep.subr.bf16.mxu0 %v1522_v51  ;;  %1134 = vmatprep.subr.bf16.mxu1 %v1523_v2 }
 0x643   :  { %1094 = vmatpush1.bf16.msra.mxu0 %v1524_v3  ;;  %1135 = vmatpush1.bf16.msra.mxu1 %v1525_v4 }
 0x6e6   :  { %v994_v7 = vpop.f32.mrf.mxu0  ;;  %v1035_v8 = vpop.f32.mrf.mxu1 }
 0x6e7   :  { %v1042_v10 = vadd.f32 %v994_v7, %v955_v5  ;;  %v1044_v21 = vadd.f32 %v1035_v8, %v957_v20 }
 0x6e8   :  { %v996_v11 = vpop.f32.mrf.mxu0  ;;  %v1037_v12 = vpop.f32.mrf.mxu1 }
 0x6e9   :  { %v1292_v13 = vmul.f32 -1.442695, %v1042_v10  ;;  %v1043_v14 = vadd.f32 %v996_v11, %v956_v9  ;;  %v1294_v23 = vmul.f32 -1.442695, %v1044_v21  ;;  %v1045_v25 = vadd.f32 %v1037_v12, %v958_v22 }
 0x6ea   :  { %v998_v15 = vpop.f32.mrf.mxu0  ;;  %v1039_v16 = vpop.f32.mrf.mxu1 }
 0x6eb   :  { %1462 = vpow2.f32 %v1292_v13  ;;  %v1293_v17 = vmul.f32 -1.442695, %v1043_v14 }
 0x6ec   :  { %v999_v18 = vpop.f32.mrf.mxu0  ;;  %v1040_v19 = vpop.f32.mrf.mxu1 }
 0x6ed   :  { %1464 = vpow2.f32 %v1293_v17 }
 0x6ee   :  { %1466 = vpow2.f32 %v1294_v23 }
 0x6f8   :  { %v1463_v24 = vpop.eup %1462 }
 0x6f9   :  { %v1055_v26 = vadd.f32 1.0, %v1463_v24 }
 0x6fa   :  { %v1465_v27 = vpop.eup %1464 }
 0x6fb   :  { %1468 = vrcp.f32 %v1055_v26  ;;  %v1056_v28 = vadd.f32 1.0, %v1465_v27  ;;  %v1467_v29 = vpop.eup %1466 }
 0x6fc   :  { %1470 = vtanh.f32 %v1045_v25  ;;  %v1057_v37 = vadd.f32 1.0, %v1467_v29 }
 0x6fd   :  { %1472 = vrcp.f32 %v1056_v28 }
 0x6fe   :  { %1474 = vrcp.f32 %v1057_v37 }
 0x708   :  { %v1469_v30 = vpop.eup %1468 }
 0x709   :  { %v1471_v31 = vpop.eup %1470 }
 0x70a   :  { %v1473_v32 = vpop.eup %1472  ;;  %v1066_v54 = vmul.f32 %v1471_v31, %v1469_v30 }
 0x70b   :  { %v1065_v52 = vmul.f32 %v1473_v32, %v1964_v53  ;;  %v1475_v56 = vpop.eup %1474 }
 0x70d   :  { %v1067_v55 = vadd.f32 %v1066_v54, %v1065_v52 }
 0x70f   :  { %1476 = vtanh.f32 %v1067_v55 }
 0x71c   :  { %v1477_v57 = vpop.eup %1476 }
 0x71d   :  { %v1069_v58 = vmul.f32 %v1477_v57, %v1475_v56 }
 0x71f   :  { %v1078_v59 = vpack.c.bf16 %v1069_v58, %v1069_v58 }
 0x721   :  { %1112 = vmatmul.mubr.bf16.vlgmr.msra.gmra.mxu0 %v1078_v59  ;;  %1153 = vmatmul.mubr.bf16.vlgmr.msra.gmra.mxu1 %v1078_v59 }
 0x7e1   :  { %v1113_v61 = vpop.f32.mrf.mxu0  ;;  %v1154_v1 = vpop.f32.mrf.mxu1 }
 0x7e2   :  { %v1161_v62 = vadd.f32 %v1113_v61, %v1074_v60  ;;  %v1163_v42 = vadd.f32 %v1154_v1, %v1076_v41 }
 0x7e3   :  { %v1115_v33 = vpop.f32.mrf.mxu0  ;;  %v1156_v53 = vpop.f32.mrf.mxu1 }
 0x7e4   :  { %v1298_v34 = vmul.f32 -1.442695, %v1161_v62  ;;  %v1162_v35 = vadd.f32 %v1115_v33, %v1075_v6  ;;  %v1300_v44 = vmul.f32 -1.442695, %v1163_v42  ;;  %v1164_v46 = vadd.f32 %v1156_v53, %v1077_v43 }
 0x7e5   :  { %v1117_v36 = vpop.f32.mrf.mxu0  ;;  %v1158_v38 = vpop.f32.mrf.mxu1 }
 0x7e6   :  { %1478 = vpow2.f32 %v1298_v34  ;;  %v1299_v39 = vmul.f32 -1.442695, %v1162_v35 }
 0x7e7   :  { %v1118_v40 = vpop.f32.mrf.mxu0  ;;  %v1159_v0 = vpop.f32.mrf.mxu1 }
 0x7e8   :  { %1480 = vpow2.f32 %v1299_v39 }
 0x7e9   :  { %1482 = vpow2.f32 %v1300_v44 }
 0x7f3   :  { %v1479_v45 = vpop.eup %1478 }
 0x7f4   :  { %v1174_v47 = vadd.f32 1.0, %v1479_v45 }
 0x7f5   :  { %v1481_v48 = vpop.eup %1480 }
 0x7f6   :  { %1484 = vrcp.f32 %v1174_v47  ;;  %v1175_v49 = vadd.f32 1.0, %v1481_v48  ;;  %v1483_v63 = vpop.eup %1482 }
 0x7f7   :  { %1486 = vtanh.f32 %v1164_v46  ;;  %v1176_v3 = vadd.f32 1.0, %v1483_v63 }
 0x7f8   :  { %1488 = vrcp.f32 %v1175_v49 }
 0x7f9   :  { %1490 = vrcp.f32 %v1176_v3 }
 0x803   :  { %v1485_v50 = vpop.eup %1484 }
 0x804   :  { %v1487_v51 = vpop.eup %1486 }
 0x805   :  { %v1489_v2 = vpop.eup %1488  ;;  %v1185_v5 = vmul.f32 %v1487_v51, %v1485_v50 }
 0x806   :  { %v1184_v4 = vmul.f32 %v1489_v2, %v1067_v55  ;;  %v1491_v8 = vpop.eup %1490 }
 0x808   :  { %v1186_v7 = vadd.f32 %v1185_v5, %v1184_v4 }
 0x80a   :  { %1492 = vtanh.f32 %v1186_v7 }
 0x817   :  { %v1493_v9 = vpop.eup %1492 }
 0x818   :  { %v1188_v10 = vmul.f32 %v1493_v9, %v1491_v8 }
 0x81a   :  { %1189 = vst [vmem:[#allocation9] sm:$0xff] %v1188_v10 }
 0x81b   :  { %1585 = shalt.err (!%p1582_p0)
}
 0x81c   :  { %1199 = dma.vmem_to_hbm [thread:$0]  %s1197_s23, 128, %s1976_s3, [#allocation6]  }
 0x81d   :  { %1600 = dma.done.wait [#allocation6], 128  }
 0x81e   :  { %1601 = vsyncadd [#allocation6], 4294967168 }
 0x81f   :  { %1203 = vsyncpa [#allocation5], 1 }
 0x820   :  { %1204 = vsyncpa [#allocation8], 1 }
 0x821   :  { %1205 = vsyncpa [#allocation6], 1 }

</bundles_post_ra>
